<compile_context>
chip_gen: v6e
topology: v6e:2x2x1
jax: 0.10.0
libtpu: 0.0.40
codegen_flags: <defaults>
</compile_context>

<pallas_src>
import functools

import jax
import jax.numpy as jnp
import numpy as np
from jax import lax
from jax.experimental import pallas as pl
from jax.experimental.pallas import tpu as pltpu

C_IN, H_IN, W_IN = 3, 32, 32           # Linear(1350) pins the input to 3x32x32
C_OUT = 6
K = 5
H_C = W_C = H_IN - K + 1               # 28 (valid conv output)
H_P = W_P = (H_C + 2 - 2) // 2 + 1     # 15 (maxpool k=2, s=2, pad=1)
FEAT = C_OUT * H_P * W_P               # 1350

# Conv-as-matmul layout constants.
ROWS_X = C_IN * H_IN                   # 96: packed-input rows, r = ci*32 + h
KBAND = 512                            # contraction dim: 5*96 shifted slabs + ones rows
BIAS_COL = K * ROWS_X                  # 480: weight column multiplying the ones row
ODD_OFF = 96                           # odd-h conv rows live at ODD_OFF + co*16 + h//2
KDIM = 2 * ODD_OFF                     # 192 conv-output rows (even block | odd block)
FROWS = C_OUT * 16                     # 96 compacted pooled-feature rows (co*16 + i)


def _kernel(x_ref, wband_ref, wlin_ref, bias_ref, out_ref, *, num_classes, tb):
    """One batch tile (tb images, interleaved on lanes) per grid step.

    x_ref     VMEM [96, LANES]      inputs, row = ci*32 + h, lane = w*tb + b_local
    wband_ref VMEM [192, 512]       banded conv+BN weights (see pack_params)
    wlin_ref  VMEM [15, 96, Npad]   linear weights, wlin[j, co*16 + i, n]
    bias_ref  VMEM [1, Npad]        linear bias (zero padded)
    out_ref   VMEM [tb, Npad]       log-probabilities (lane-dense, padded)
    """
    f32 = jnp.float32
    npad = out_ref.shape[-1]
    lanes = x_ref.shape[-1]

    # ---- Conv + BatchNorm(eval, folded) + bias: one MXU matmul ---------------------
    # x_all stacks kw-shifted copies of the input along the contraction dim plus a
    # block of ones; wband's BIAS_COL column carries the per-channel shift so the
    # bias rides the same matmul.  Lane-roll wraparound only pollutes columns
    # w >= 28, which are masked below.
    x96 = x_ref[...]                                            # [96, LANES]
    parts = [x96]
    for kw in range(1, K):
        parts.append(pltpu.roll(x96, shift=lanes - kw * tb, axis=1))
    parts.append(jnp.ones((KBAND - K * ROWS_X, lanes), f32))
    x_all = jnp.concatenate(parts, axis=0)                      # [512, LANES]

    acc = jnp.dot(wband_ref[...], x_all, preferred_element_type=f32)   # [192, LANES]
    # ReLU + zero columns w >= 28 (conv-invalid / wraparound).  Unused rows are
    # exactly zero already (zero weight rows, including the bias column).
    lane = lax.broadcasted_iota(jnp.int32, (KDIM, lanes), 1)
    yall = jnp.where(lane < H_C * tb, jnp.maximum(acc, 0.0), 0.0)

    # ---- MaxPool2d(k=2, s=2, padding=1) via shifted maxes --------------------------
    # Post-ReLU values are >= 0, so zeros stand in for PyTorch's -inf padding.
    # H: even-h value for pooled row i sits at co*16 + i, its odd-h partner at +95;
    # a single roll+max leaves pooled rows dense in [0, 96).
    m_h = jnp.maximum(yall, pltpu.roll(yall, shift=KDIM - (ODD_OFF - 1), axis=0))
    m_hc = m_h[:FROWS, :]                                       # [96, LANES]
    # W: pooled column j lives at w = 2j, its partner is w = 2j - 1 (one lane roll).
    m2 = jnp.maximum(m_hc, pltpu.roll(m_hc, shift=tb, axis=1))
    # pooled[b, co, i, j] = m2[co*16 + i, (2j)*tb + b]

    # ---- Flatten + Linear on the MXU (compacted K = 96 per pooled column) ----------
    feat_t = jnp.transpose(m2)                                  # [LANES, 96], row = w*tb + b
    logits = jnp.zeros((tb, npad), f32)
    for j in range(W_P):                                        # 15 dots [tb,96]@[96,Npad]
        feat_j = feat_t[2 * j * tb:(2 * j + 1) * tb, :]
        logits = logits + jnp.dot(feat_j, wlin_ref[j], preferred_element_type=f32)
    logits = logits + bias_ref[...]

    # ---- LogSoftmax over the valid classes ------------------------------------------
    cls = lax.broadcasted_iota(jnp.int32, (tb, npad), 1)
    masked = jnp.where(cls < num_classes, logits, -jnp.inf)
    mx = jnp.max(masked, axis=1, keepdims=True)
    ex = jnp.where(cls < num_classes, jnp.exp(logits - mx), 0.0)
    lse = mx + jnp.log(jnp.sum(ex, axis=1, keepdims=True))
    out_ref[...] = logits - lse


def mnist_wildlife_forward(x, packed_params, num_classes):
    wband, wlin, bias_pad = packed_params
    b = x.shape[0]
    npad = wlin.shape[-1]
    # tb=16 for large batches (amortize per-step overhead, fatter matmul M); tb=8
    # keeps >= 2 grid steps for medium batches so v7x's two TensorCores are fed.
    tb = 16 if b > 16 else 8
    lanes = tb * W_IN
    nb = pl.cdiv(b, tb)
    bp = nb * tb
    xpad = jnp.pad(x, ((0, bp - b), (0, 0), (0, 0), (0, 0)))
    # [B,3,32,32] -> [96, nb*lanes]: row = ci*32 + h, lane = w*tb + b_local.
    xp = (xpad.reshape(nb, tb, C_IN, H_IN, W_IN)
              .transpose(2, 3, 0, 4, 1)
              .reshape(ROWS_X, nb * lanes))

    out = pl.pallas_call(
        functools.partial(_kernel, num_classes=num_classes, tb=tb),
        out_shape=jax.ShapeDtypeStruct((bp, npad), jnp.float32),
        grid_spec=pltpu.PrefetchScalarGridSpec(
            num_scalar_prefetch=0,
            grid=(nb,),
            in_specs=[
                pl.BlockSpec((ROWS_X, lanes), lambda i: (0, i)),
                pl.BlockSpec((KDIM, KBAND), lambda i: (0, 0)),          # banded conv w
                pl.BlockSpec((W_P, FROWS, npad), lambda i: (0, 0, 0)),  # linear w
                pl.BlockSpec((1, npad), lambda i: (0, 0)),              # linear bias
            ],
            out_specs=pl.BlockSpec((tb, npad), lambda i: (i, 0)),
        ),
        compiler_params=pltpu.CompilerParams(
            dimension_semantics=("parallel",),
            vmem_limit_bytes=32 * 1024 * 1024),
    )(xp, wband, wlin, bias_pad)
    return out[:b, :num_classes]


# ------------------------------ parameter setup (glue) ------------------------------
def init_params(key, num_classes):
    ks = jax.random.split(key, 8)
    conv_w = jax.random.normal(ks[0], (C_OUT, C_IN, K, K), jnp.float32) / np.sqrt(C_IN * K * K)
    conv_b = 0.1 * jax.random.normal(ks[1], (C_OUT,), jnp.float32)
    gamma = 1.0 + 0.1 * jax.random.normal(ks[2], (C_OUT,), jnp.float32)
    beta = 0.1 * jax.random.normal(ks[3], (C_OUT,), jnp.float32)
    mean = 0.05 * jax.random.normal(ks[4], (C_OUT,), jnp.float32)
    var = 1.0 + 0.1 * jnp.abs(jax.random.normal(ks[5], (C_OUT,), jnp.float32))
    lin_w = jax.random.normal(ks[6], (num_classes, FEAT), jnp.float32) / np.sqrt(FEAT)
    lin_b = 0.1 * jax.random.normal(ks[7], (num_classes,), jnp.float32)
    return dict(conv_w=conv_w, conv_b=conv_b, gamma=gamma, beta=beta,
                mean=mean, var=var, eps=1e-5, lin_w=lin_w, lin_b=lin_b)


def pack_params(p, num_classes):
    npad = max(128, ((num_classes + 127) // 128) * 128)
    scale = np.asarray(p["gamma"] / jnp.sqrt(p["var"] + p["eps"]))           # [6]
    w_fold = np.asarray(p["conv_w"]) * scale[:, None, None, None]            # [6,3,5,5]
    shift = np.asarray(p["beta"]) + (np.asarray(p["conv_b"]) - np.asarray(p["mean"])) * scale

    # Banded conv weights.  Output row r(co,h) = co*16 + h//2 (+ODD_OFF if h odd);
    # contraction column = kw*96 + ci*32 + (h + kh); column BIAS_COL multiplies the
    # constant-ones block of x_all and carries the folded BN/conv shift.  All other
    # rows/columns are zero (this exact-zero structure is what the pooling relies on).
    wband = np.zeros((KDIM, KBAND), np.float32)
    for co in range(C_OUT):
        for h in range(H_C):
            r = co * 16 + h // 2 + (ODD_OFF if h % 2 else 0)
            for ci in range(C_IN):
                for kh in range(K):
                    cols = np.arange(K) * ROWS_X + ci * H_IN + h + kh
                    wband[r, cols] = w_fold[co, ci, kh, :]
            wband[r, BIAS_COL] = shift[co]

    # Linear weights in the compacted pooled-feature layout:
    # wlin[j, co*16 + i, n] = lin_w[n, co*225 + i*15 + j]; zeros at i = 15.
    wr = np.asarray(p["lin_w"]).reshape(num_classes, C_OUT, H_P, W_P)        # [n,co,i,j]
    wl = np.zeros((W_P, C_OUT, 16, npad), np.float32)
    wl[:, :, :H_P, :num_classes] = np.transpose(wr, (3, 1, 2, 0))            # [j,co,i,n]
    wlin = wl.reshape(W_P, FROWS, npad)

    bias_pad = np.zeros((1, npad), np.float32)
    bias_pad[0, :num_classes] = np.asarray(p["lin_b"])
    return jnp.asarray(wband), jnp.asarray(wlin), jnp.asarray(bias_pad)


# ------------------------------ pure-JAX reference ----------------------------------
def reference_forward(x, p):
    y = jax.lax.conv_general_dilated(
        x, p["conv_w"], (1, 1), "VALID", dimension_numbers=("NCHW", "OIHW", "NCHW"))
    y = y + p["conv_b"][None, :, None, None]
    y = (y - p["mean"][None, :, None, None]) / jnp.sqrt(p["var"][None, :, None, None] + p["eps"])
    y = y * p["gamma"][None, :, None, None] + p["beta"][None, :, None, None]
    y = jnp.maximum(y, 0.0)
    y = jax.lax.reduce_window(
        y, -jnp.inf, jax.lax.max, (1, 1, 2, 2), (1, 1, 2, 2),
        ((0, 0), (0, 0), (1, 1), (1, 1)))
    f = y.reshape(y.shape[0], -1)
    logits = f @ p["lin_w"].T + p["lin_b"][None, :]
    return jax.nn.log_softmax(logits, axis=1)


if __name__ == "__main__":
    num_classes = 10
    key = jax.random.PRNGKey(0)
    kx, kp = jax.random.split(key)
    x = jax.random.normal(kx, (2, C_IN, H_IN, W_IN), jnp.float32)

    params = init_params(kp, num_classes)
    packed = pack_params(params, num_classes)

    out = mnist_wildlife_forward(x, packed, num_classes)
    out = jax.block_until_ready(out)

    ref = jax.block_until_ready(reference_forward(x, params))
    np.testing.assert_allclose(np.asarray(out), np.asarray(ref), atol=1e-3, rtol=1e-3)
    print("KERNEL_OK")
</pallas_src>

<mosaic_0001>
module attributes {stable_mosaic.version = 11 : i64} {
  func.func @_kernel(%arg0: i32, %arg1: memref<96x256xf32, #tpu.memory_space<vmem>>, %arg2: memref<192x512xf32, #tpu.memory_space<vmem>>, %arg3: memref<15x96x128xf32, #tpu.memory_space<vmem>>, %arg4: memref<1x128xf32, #tpu.memory_space<vmem>>, %arg5: memref<8x128xf32, #tpu.memory_space<vmem>>) attributes {dimension_semantics = [#tpu.dimension_semantics<parallel>], iteration_bounds = array<i64: 1>, scalar_prefetch = 0 : i64, scratch_operands = 0 : i64, tpu.core_type = #tpu.core_type<tc>, window_params = [{transform_indices = @transform_0, window_bounds = array<i64: 96, 256>}, {pipeline_mode = #tpu.pipeline_mode<synchronous>, transform_indices = @transform_1, window_bounds = array<i64: 192, 512>}, {pipeline_mode = #tpu.pipeline_mode<synchronous>, transform_indices = @transform_2, window_bounds = array<i64: 15, 96, 128>}, {pipeline_mode = #tpu.pipeline_mode<synchronous>, transform_indices = @transform_3, window_bounds = array<i64: 1, 128>}, {transform_indices = @transform_4, window_bounds = array<i64: 8, 128>}]} {
    %c0 = arith.constant 0 : index
    %c0_0 = arith.constant 0 : index
    %0 = vector.load %arg1[%c0, %c0_0] : memref<96x256xf32, #tpu.memory_space<vmem>>, vector<96x256xf32>
    %c248_i32 = arith.constant 248 : i32
    %1 = tpu.dynamic_rotate %0 by %c248_i32 dim 1 : vector<96x256xf32>, i32 -> vector<96x256xf32>
    %c240_i32 = arith.constant 240 : i32
    %2 = tpu.dynamic_rotate %0 by %c240_i32 dim 1 : vector<96x256xf32>, i32 -> vector<96x256xf32>
    %c232_i32 = arith.constant 232 : i32
    %3 = tpu.dynamic_rotate %0 by %c232_i32 dim 1 : vector<96x256xf32>, i32 -> vector<96x256xf32>
    %c224_i32 = arith.constant 224 : i32
    %4 = tpu.dynamic_rotate %0 by %c224_i32 dim 1 : vector<96x256xf32>, i32 -> vector<96x256xf32>
    %cst = arith.constant 1.000000e+00 : f32
    %5 = vector.broadcast %cst : f32 to vector<32x256xf32>
    %6 = tpu.concatenate %0, %1, %2, %3, %4, %5 in 0 : vector<96x256xf32>, vector<96x256xf32>, vector<96x256xf32>, vector<96x256xf32>, vector<96x256xf32>, vector<32x256xf32> -> vector<512x256xf32>
    %c0_1 = arith.constant 0 : index
    %c0_2 = arith.constant 0 : index
    %7 = vector.load %arg2[%c0_1, %c0_2] : memref<192x512xf32, #tpu.memory_space<vmem>>, vector<192x512xf32>
    %cst_3 = arith.constant dense<0.000000e+00> : vector<192x256xf32>
    %8 = tpu.matmul %7, %6, %cst_3 {dimension_numbers = #tpu.dot_dimension_numbers<[1], [0], [0], [1], [0, 0, 1, 1], [], []>} : vector<192x512xf32>, vector<512x256xf32>, vector<192x256xf32> -> vector<192x256xf32>
    %9 = tpu.iota {dimensions = array<i32: 1>} : vector<192x256xi32>
    %c224_i32_4 = arith.constant 224 : i32
    %10 = vector.broadcast %c224_i32_4 : i32 to vector<192x256xi32>
    %11 = arith.cmpi slt, %9, %10 : vector<192x256xi32>
    %cst_5 = arith.constant 0.000000e+00 : f32
    %12 = vector.broadcast %cst_5 : f32 to vector<192x256xf32>
    %13 = arith.maximumf %8, %12 : vector<192x256xf32>
    %cst_6 = arith.constant 0.000000e+00 : f32
    %14 = vector.broadcast %cst_6 : f32 to vector<192x256xf32>
    %15 = arith.select %11, %13, %14 : vector<192x256xi1>, vector<192x256xf32>
    %c97_i32 = arith.constant 97 : i32
    %16 = tpu.dynamic_rotate %15 by %c97_i32 dim 0 : vector<192x256xf32>, i32 -> vector<192x256xf32>
    %17 = arith.maximumf %15, %16 : vector<192x256xf32>
    %18 = vector.extract_strided_slice %17 {offsets = [0, 0], sizes = [96, 256], strides = [1, 1]} : vector<192x256xf32> to vector<96x256xf32>
    %c8_i32 = arith.constant 8 : i32
    %19 = tpu.dynamic_rotate %18 by %c8_i32 dim 1 : vector<96x256xf32>, i32 -> vector<96x256xf32>
    %20 = arith.maximumf %18, %19 : vector<96x256xf32>
    %21 = tpu.transpose %20, [1, 0] : vector<96x256xf32> -> vector<256x96xf32>
    %cst_7 = arith.constant 0.000000e+00 : f32
    %22 = vector.broadcast %cst_7 : f32 to vector<8x128xf32>
    %23 = vector.extract_strided_slice %21 {offsets = [0, 0], sizes = [8, 96], strides = [1, 1]} : vector<256x96xf32> to vector<8x96xf32>
    %c0_8 = arith.constant 0 : index
    %c0_9 = arith.constant 0 : index
    %c0_10 = arith.constant 0 : index
    %24 = vector.load %arg3[%c0_8, %c0_9, %c0_10] : memref<15x96x128xf32, #tpu.memory_space<vmem>>, vector<1x96x128xf32>
    %25 = vector.shape_cast %24 : vector<1x96x128xf32> to vector<96x128xf32>
    %cst_11 = arith.constant dense<0.000000e+00> : vector<8x128xf32>
    %26 = tpu.matmul %23, %25, %cst_11 {dimension_numbers = #tpu.dot_dimension_numbers<[1], [0], [0], [1], [0, 0, 1, 1], [], []>} : vector<8x96xf32>, vector<96x128xf32>, vector<8x128xf32> -> vector<8x128xf32>
    %27 = arith.addf %22, %26 : vector<8x128xf32>
    %28 = vector.extract_strided_slice %21 {offsets = [16, 0], sizes = [8, 96], strides = [1, 1]} : vector<256x96xf32> to vector<8x96xf32>
    %c1 = arith.constant 1 : index
    %c0_12 = arith.constant 0 : index
    %c0_13 = arith.constant 0 : index
    %29 = vector.load %arg3[%c1, %c0_12, %c0_13] : memref<15x96x128xf32, #tpu.memory_space<vmem>>, vector<1x96x128xf32>
    %30 = vector.shape_cast %29 : vector<1x96x128xf32> to vector<96x128xf32>
    %cst_14 = arith.constant dense<0.000000e+00> : vector<8x128xf32>
    %31 = tpu.matmul %28, %30, %cst_14 {dimension_numbers = #tpu.dot_dimension_numbers<[1], [0], [0], [1], [0, 0, 1, 1], [], []>} : vector<8x96xf32>, vector<96x128xf32>, vector<8x128xf32> -> vector<8x128xf32>
    %32 = arith.addf %27, %31 : vector<8x128xf32>
    %33 = vector.extract_strided_slice %21 {offsets = [32, 0], sizes = [8, 96], strides = [1, 1]} : vector<256x96xf32> to vector<8x96xf32>
    %c2 = arith.constant 2 : index
    %c0_15 = arith.constant 0 : index
    %c0_16 = arith.constant 0 : index
    %34 = vector.load %arg3[%c2, %c0_15, %c0_16] : memref<15x96x128xf32, #tpu.memory_space<vmem>>, vector<1x96x128xf32>
    %35 = vector.shape_cast %34 : vector<1x96x128xf32> to vector<96x128xf32>
    %cst_17 = arith.constant dense<0.000000e+00> : vector<8x128xf32>
    %36 = tpu.matmul %33, %35, %cst_17 {dimension_numbers = #tpu.dot_dimension_numbers<[1], [0], [0], [1], [0, 0, 1, 1], [], []>} : vector<8x96xf32>, vector<96x128xf32>, vector<8x128xf32> -> vector<8x128xf32>
    %37 = arith.addf %32, %36 : vector<8x128xf32>
    %38 = vector.extract_strided_slice %21 {offsets = [48, 0], sizes = [8, 96], strides = [1, 1]} : vector<256x96xf32> to vector<8x96xf32>
    %c3 = arith.constant 3 : index
    %c0_18 = arith.constant 0 : index
    %c0_19 = arith.constant 0 : index
    %39 = vector.load %arg3[%c3, %c0_18, %c0_19] : memref<15x96x128xf32, #tpu.memory_space<vmem>>, vector<1x96x128xf32>
    %40 = vector.shape_cast %39 : vector<1x96x128xf32> to vector<96x128xf32>
    %cst_20 = arith.constant dense<0.000000e+00> : vector<8x128xf32>
    %41 = tpu.matmul %38, %40, %cst_20 {dimension_numbers = #tpu.dot_dimension_numbers<[1], [0], [0], [1], [0, 0, 1, 1], [], []>} : vector<8x96xf32>, vector<96x128xf32>, vector<8x128xf32> -> vector<8x128xf32>
    %42 = arith.addf %37, %41 : vector<8x128xf32>
    %43 = vector.extract_strided_slice %21 {offsets = [64, 0], sizes = [8, 96], strides = [1, 1]} : vector<256x96xf32> to vector<8x96xf32>
    %c4 = arith.constant 4 : index
    %c0_21 = arith.constant 0 : index
    %c0_22 = arith.constant 0 : index
    %44 = vector.load %arg3[%c4, %c0_21, %c0_22] : memref<15x96x128xf32, #tpu.memory_space<vmem>>, vector<1x96x128xf32>
    %45 = vector.shape_cast %44 : vector<1x96x128xf32> to vector<96x128xf32>
    %cst_23 = arith.constant dense<0.000000e+00> : vector<8x128xf32>
    %46 = tpu.matmul %43, %45, %cst_23 {dimension_numbers = #tpu.dot_dimension_numbers<[1], [0], [0], [1], [0, 0, 1, 1], [], []>} : vector<8x96xf32>, vector<96x128xf32>, vector<8x128xf32> -> vector<8x128xf32>
    %47 = arith.addf %42, %46 : vector<8x128xf32>
    %48 = vector.extract_strided_slice %21 {offsets = [80, 0], sizes = [8, 96], strides = [1, 1]} : vector<256x96xf32> to vector<8x96xf32>
    %c5 = arith.constant 5 : index
    %c0_24 = arith.constant 0 : index
    %c0_25 = arith.constant 0 : index
    %49 = vector.load %arg3[%c5, %c0_24, %c0_25] : memref<15x96x128xf32, #tpu.memory_space<vmem>>, vector<1x96x128xf32>
    %50 = vector.shape_cast %49 : vector<1x96x128xf32> to vector<96x128xf32>
    %cst_26 = arith.constant dense<0.000000e+00> : vector<8x128xf32>
    %51 = tpu.matmul %48, %50, %cst_26 {dimension_numbers = #tpu.dot_dimension_numbers<[1], [0], [0], [1], [0, 0, 1, 1], [], []>} : vector<8x96xf32>, vector<96x128xf32>, vector<8x128xf32> -> vector<8x128xf32>
    %52 = arith.addf %47, %51 : vector<8x128xf32>
    %53 = vector.extract_strided_slice %21 {offsets = [96, 0], sizes = [8, 96], strides = [1, 1]} : vector<256x96xf32> to vector<8x96xf32>
    %c6 = arith.constant 6 : index
    %c0_27 = arith.constant 0 : index
    %c0_28 = arith.constant 0 : index
    %54 = vector.load %arg3[%c6, %c0_27, %c0_28] : memref<15x96x128xf32, #tpu.memory_space<vmem>>, vector<1x96x128xf32>
    %55 = vector.shape_cast %54 : vector<1x96x128xf32> to vector<96x128xf32>
    %cst_29 = arith.constant dense<0.000000e+00> : vector<8x128xf32>
    %56 = tpu.matmul %53, %55, %cst_29 {dimension_numbers = #tpu.dot_dimension_numbers<[1], [0], [0], [1], [0, 0, 1, 1], [], []>} : vector<8x96xf32>, vector<96x128xf32>, vector<8x128xf32> -> vector<8x128xf32>
    %57 = arith.addf %52, %56 : vector<8x128xf32>
    %58 = vector.extract_strided_slice %21 {offsets = [112, 0], sizes = [8, 96], strides = [1, 1]} : vector<256x96xf32> to vector<8x96xf32>
    %c7 = arith.constant 7 : index
    %c0_30 = arith.constant 0 : index
    %c0_31 = arith.constant 0 : index
    %59 = vector.load %arg3[%c7, %c0_30, %c0_31] : memref<15x96x128xf32, #tpu.memory_space<vmem>>, vector<1x96x128xf32>
    %60 = vector.shape_cast %59 : vector<1x96x128xf32> to vector<96x128xf32>
    %cst_32 = arith.constant dense<0.000000e+00> : vector<8x128xf32>
    %61 = tpu.matmul %58, %60, %cst_32 {dimension_numbers = #tpu.dot_dimension_numbers<[1], [0], [0], [1], [0, 0, 1, 1], [], []>} : vector<8x96xf32>, vector<96x128xf32>, vector<8x128xf32> -> vector<8x128xf32>
    %62 = arith.addf %57, %61 : vector<8x128xf32>
    %63 = vector.extract_strided_slice %21 {offsets = [128, 0], sizes = [8, 96], strides = [1, 1]} : vector<256x96xf32> to vector<8x96xf32>
    %c8 = arith.constant 8 : index
    %c0_33 = arith.constant 0 : index
    %c0_34 = arith.constant 0 : index
    %64 = vector.load %arg3[%c8, %c0_33, %c0_34] : memref<15x96x128xf32, #tpu.memory_space<vmem>>, vector<1x96x128xf32>
    %65 = vector.shape_cast %64 : vector<1x96x128xf32> to vector<96x128xf32>
    %cst_35 = arith.constant dense<0.000000e+00> : vector<8x128xf32>
    %66 = tpu.matmul %63, %65, %cst_35 {dimension_numbers = #tpu.dot_dimension_numbers<[1], [0], [0], [1], [0, 0, 1, 1], [], []>} : vector<8x96xf32>, vector<96x128xf32>, vector<8x128xf32> -> vector<8x128xf32>
    %67 = arith.addf %62, %66 : vector<8x128xf32>
    %68 = vector.extract_strided_slice %21 {offsets = [144, 0], sizes = [8, 96], strides = [1, 1]} : vector<256x96xf32> to vector<8x96xf32>
    %c9 = arith.constant 9 : index
    %c0_36 = arith.constant 0 : index
    %c0_37 = arith.constant 0 : index
    %69 = vector.load %arg3[%c9, %c0_36, %c0_37] : memref<15x96x128xf32, #tpu.memory_space<vmem>>, vector<1x96x128xf32>
    %70 = vector.shape_cast %69 : vector<1x96x128xf32> to vector<96x128xf32>
    %cst_38 = arith.constant dense<0.000000e+00> : vector<8x128xf32>
    %71 = tpu.matmul %68, %70, %cst_38 {dimension_numbers = #tpu.dot_dimension_numbers<[1], [0], [0], [1], [0, 0, 1, 1], [], []>} : vector<8x96xf32>, vector<96x128xf32>, vector<8x128xf32> -> vector<8x128xf32>
    %72 = arith.addf %67, %71 : vector<8x128xf32>
    %73 = vector.extract_strided_slice %21 {offsets = [160, 0], sizes = [8, 96], strides = [1, 1]} : vector<256x96xf32> to vector<8x96xf32>
    %c10 = arith.constant 10 : index
    %c0_39 = arith.constant 0 : index
    %c0_40 = arith.constant 0 : index
    %74 = vector.load %arg3[%c10, %c0_39, %c0_40] : memref<15x96x128xf32, #tpu.memory_space<vmem>>, vector<1x96x128xf32>
    %75 = vector.shape_cast %74 : vector<1x96x128xf32> to vector<96x128xf32>
    %cst_41 = arith.constant dense<0.000000e+00> : vector<8x128xf32>
    %76 = tpu.matmul %73, %75, %cst_41 {dimension_numbers = #tpu.dot_dimension_numbers<[1], [0], [0], [1], [0, 0, 1, 1], [], []>} : vector<8x96xf32>, vector<96x128xf32>, vector<8x128xf32> -> vector<8x128xf32>
    %77 = arith.addf %72, %76 : vector<8x128xf32>
    %78 = vector.extract_strided_slice %21 {offsets = [176, 0], sizes = [8, 96], strides = [1, 1]} : vector<256x96xf32> to vector<8x96xf32>
    %c11 = arith.constant 11 : index
    %c0_42 = arith.constant 0 : index
    %c0_43 = arith.constant 0 : index
    %79 = vector.load %arg3[%c11, %c0_42, %c0_43] : memref<15x96x128xf32, #tpu.memory_space<vmem>>, vector<1x96x128xf32>
    %80 = vector.shape_cast %79 : vector<1x96x128xf32> to vector<96x128xf32>
    %cst_44 = arith.constant dense<0.000000e+00> : vector<8x128xf32>
    %81 = tpu.matmul %78, %80, %cst_44 {dimension_numbers = #tpu.dot_dimension_numbers<[1], [0], [0], [1], [0, 0, 1, 1], [], []>} : vector<8x96xf32>, vector<96x128xf32>, vector<8x128xf32> -> vector<8x128xf32>
    %82 = arith.addf %77, %81 : vector<8x128xf32>
    %83 = vector.extract_strided_slice %21 {offsets = [192, 0], sizes = [8, 96], strides = [1, 1]} : vector<256x96xf32> to vector<8x96xf32>
    %c12 = arith.constant 12 : index
    %c0_45 = arith.constant 0 : index
    %c0_46 = arith.constant 0 : index
    %84 = vector.load %arg3[%c12, %c0_45, %c0_46] : memref<15x96x128xf32, #tpu.memory_space<vmem>>, vector<1x96x128xf32>
    %85 = vector.shape_cast %84 : vector<1x96x128xf32> to vector<96x128xf32>
    %cst_47 = arith.constant dense<0.000000e+00> : vector<8x128xf32>
    %86 = tpu.matmul %83, %85, %cst_47 {dimension_numbers = #tpu.dot_dimension_numbers<[1], [0], [0], [1], [0, 0, 1, 1], [], []>} : vector<8x96xf32>, vector<96x128xf32>, vector<8x128xf32> -> vector<8x128xf32>
    %87 = arith.addf %82, %86 : vector<8x128xf32>
    %88 = vector.extract_strided_slice %21 {offsets = [208, 0], sizes = [8, 96], strides = [1, 1]} : vector<256x96xf32> to vector<8x96xf32>
    %c13 = arith.constant 13 : index
    %c0_48 = arith.constant 0 : index
    %c0_49 = arith.constant 0 : index
    %89 = vector.load %arg3[%c13, %c0_48, %c0_49] : memref<15x96x128xf32, #tpu.memory_space<vmem>>, vector<1x96x128xf32>
    %90 = vector.shape_cast %89 : vector<1x96x128xf32> to vector<96x128xf32>
    %cst_50 = arith.constant dense<0.000000e+00> : vector<8x128xf32>
    %91 = tpu.matmul %88, %90, %cst_50 {dimension_numbers = #tpu.dot_dimension_numbers<[1], [0], [0], [1], [0, 0, 1, 1], [], []>} : vector<8x96xf32>, vector<96x128xf32>, vector<8x128xf32> -> vector<8x128xf32>
    %92 = arith.addf %87, %91 : vector<8x128xf32>
    %93 = vector.extract_strided_slice %21 {offsets = [224, 0], sizes = [8, 96], strides = [1, 1]} : vector<256x96xf32> to vector<8x96xf32>
    %c14 = arith.constant 14 : index
    %c0_51 = arith.constant 0 : index
    %c0_52 = arith.constant 0 : index
    %94 = vector.load %arg3[%c14, %c0_51, %c0_52] : memref<15x96x128xf32, #tpu.memory_space<vmem>>, vector<1x96x128xf32>
    %95 = vector.shape_cast %94 : vector<1x96x128xf32> to vector<96x128xf32>
    %cst_53 = arith.constant dense<0.000000e+00> : vector<8x128xf32>
    %96 = tpu.matmul %93, %95, %cst_53 {dimension_numbers = #tpu.dot_dimension_numbers<[1], [0], [0], [1], [0, 0, 1, 1], [], []>} : vector<8x96xf32>, vector<96x128xf32>, vector<8x128xf32> -> vector<8x128xf32>
    %97 = arith.addf %92, %96 : vector<8x128xf32>
    %c0_54 = arith.constant 0 : index
    %c0_55 = arith.constant 0 : index
    %98 = vector.load %arg4[%c0_54, %c0_55] : memref<1x128xf32, #tpu.memory_space<vmem>>, vector<1x128xf32>
    %99 = vector.broadcast %98 : vector<1x128xf32> to vector<8x128xf32>
    %100 = arith.addf %97, %99 : vector<8x128xf32>
    %101 = tpu.iota {dimensions = array<i32: 1>} : vector<8x128xi32>
    %c10_i32 = arith.constant 10 : i32
    %102 = vector.broadcast %c10_i32 : i32 to vector<8x128xi32>
    %103 = arith.cmpi slt, %101, %102 : vector<8x128xi32>
    %cst_56 = arith.constant 0xFF800000 : f32
    %104 = vector.broadcast %cst_56 : f32 to vector<8x128xf32>
    %105 = arith.select %103, %100, %104 : vector<8x128xi1>, vector<8x128xf32>
    %cst_57 = arith.constant dense<0xFF800000> : vector<8xf32>
    %106 = vector.multi_reduction <maximumf>, %105, %cst_57 [1] : vector<8x128xf32> to vector<8xf32>
    %107 = vector.shape_cast %106 : vector<8xf32> to vector<8x1xf32>
    %c10_i32_58 = arith.constant 10 : i32
    %108 = vector.broadcast %c10_i32_58 : i32 to vector<8x128xi32>
    %109 = arith.cmpi slt, %101, %108 : vector<8x128xi32>
    %110 = vector.broadcast %107 : vector<8x1xf32> to vector<8x128xf32>
    %111 = arith.subf %100, %110 : vector<8x128xf32>
    %112 = math.exp %111 : vector<8x128xf32>
    %cst_59 = arith.constant 0.000000e+00 : f32
    %113 = vector.broadcast %cst_59 : f32 to vector<8x128xf32>
    %114 = arith.select %109, %112, %113 : vector<8x128xi1>, vector<8x128xf32>
    %cst_60 = arith.constant dense<0.000000e+00> : vector<8xf32>
    %115 = vector.multi_reduction <add>, %114, %cst_60 [1] : vector<8x128xf32> to vector<8xf32>
    %116 = vector.shape_cast %115 : vector<8xf32> to vector<8x1xf32>
    %117 = math.log %116 : vector<8x1xf32>
    %118 = arith.addf %107, %117 : vector<8x1xf32>
    %119 = vector.broadcast %118 : vector<8x1xf32> to vector<8x128xf32>
    %120 = arith.subf %100, %119 : vector<8x128xf32>
    %c0_61 = arith.constant 0 : index
    %c0_62 = arith.constant 0 : index
    %121 = vector.load %arg5[%c0_61, %c0_62] : memref<8x128xf32, #tpu.memory_space<vmem>>, vector<8x128xf32>
    tpu.vector_store %arg5[%c0_61, %c0_62], %120 {strides = array<i32>} : memref<8x128xf32, #tpu.memory_space<vmem>>, vector<8x128xf32>,
    return
  }
  func.func @transform_0(%arg0: i32) -> (i32, i32) {
    %c0_i32 = arith.constant 0 : i32
    %c0_i32_0 = arith.constant 0 : i32
    return %c0_i32, %arg0 : i32, i32
  }
  func.func @transform_1(%arg0: i32) -> (i32, i32) {
    %c0_i32 = arith.constant 0 : i32
    %c0_i32_0 = arith.constant 0 : i32
    %c0_i32_1 = arith.constant 0 : i32
    return %c0_i32, %c0_i32_0 : i32, i32
  }
  func.func @transform_2(%arg0: i32) -> (i32, i32, i32) {
    %c0_i32 = arith.constant 0 : i32
    %c0_i32_0 = arith.constant 0 : i32
    %c0_i32_1 = arith.constant 0 : i32
    %c0_i32_2 = arith.constant 0 : i32
    return %c0_i32, %c0_i32_0, %c0_i32_1 : i32, i32, i32
  }
  func.func @transform_3(%arg0: i32) -> (i32, i32) {
    %c0_i32 = arith.constant 0 : i32
    %c0_i32_0 = arith.constant 0 : i32
    %c0_i32_1 = arith.constant 0 : i32
    return %c0_i32, %c0_i32_0 : i32, i32
  }
  func.func @transform_4(%arg0: i32) -> (i32, i32) {
    %c0_i32 = arith.constant 0 : i32
    %c0_i32_0 = arith.constant 0 : i32
    return %arg0, %c0_i32 : i32, i32
  }
}

</mosaic_0001>

<bundles_post_ra>
// kernel: tpu_custom_call.1
= control target key start
LH: loop header
LB: loop body
LE: loop exit
PB: predicated region body
PF: predicated region fallthrough
CT: control target
= control target key end

     0   :  { %9 = vsyncpa [#allocation3], 0  ;;  %s4459_s0 = inlined_call_operand.hbm [shape: f32[96,256], index: 0, kind: input, shape index: {}]   ;;  %s4460_s1 = inlined_call_operand.hbm [shape: f32[192,512], index: 1, kind: input, shape index: {}]   ;;  %s4461_s2 = inlined_call_operand.hbm [shape: f32[15,96,128], index: 2, kind: input, shape index: {}]   ;;  %s4462_s3 = inlined_call_operand.vmem [shape: f32[1,128], index: 3, kind: input, shape index: {}]   ;;  %s4463_s4 = inlined_call_operand.hbm [shape: f32[8,128], index: 4, kind: output, shape index: {}]  }
   0x1   :  { %10 = vsyncpa [#allocation6], 0 }
   0x2   :  { %11 = vsyncpa [#allocation4], 0  ;;  %s3293_s15 = smov [#allocation5]  }
   0x3   :  { %s29_s16 = sshll.u32 %s3293_s15, 4  ;;  %s30_s16 = int_to_ptr.vmem [resolvable:$true] %s29_s16 }
   0x4   :  { %s3215_s17 = scalar_lea.vmem %s30_s16, 12288  ;;  %p3220_p1 = scmp.lt.s32.totalorder %s30_s16, %s30_s16 }
   0x5   :  { %p3216_p0 = scmp.ne.s32.totalorder %s30_s16, %s3215_s17  ;;  %p3221_p2 = scmp.lt.s32.totalorder %s3215_s17, %s3215_s17 }
   0x7   :  { %p3222_p3 = por %p3221_p2, %p3220_p1 }
   0x9   :  { %p3223_p4 = pnand %p3222_p3, %p3216_p0 }
   0xb   :  { %3226 = shalt.err (!%p3223_p4)
}
   0xc   :  { %s3294_s18 = smov 512   ;;  %s3295_s19 = smov 32  }
   0xd   :  { %35 = dma.hbm_to_vmem [thread:$0]  %s4460_s1, 12288, %s30_s16, [#allocation6], %s3294_s18, %s3294_s18, %s3295_s19  }
   0xe   :  { %s3296_s22 = smov [#allocation2]  }
   0xf   :  { %s17_s23 = sshll.u32 %s3296_s22, 4  ;;  %s18_s23 = int_to_ptr.vmem [resolvable:$true] %s17_s23 }
  0x10   :  { %s3235_s24 = scalar_lea.vmem %s18_s23, 3072  ;;  %p3240_p6 = scmp.lt.s32.totalorder %s18_s23, %s18_s23 }
  0x11   :  { %p3236_p5 = scmp.ne.s32.totalorder %s18_s23, %s3235_s24  ;;  %p3241_p7 = scmp.lt.s32.totalorder %s3235_s24, %s3235_s24 }
  0x13   :  { %p3242_p8 = por %p3241_p7, %p3240_p6 }
  0x15   :  { %p3243_p9 = pnand %p3242_p8, %p3236_p5 }
  0x17   :  { %3246 = shalt.err (!%p3243_p9)
}
  0x18   :  { %s3297_s25 = smov 256   ;;  %s3298_s26 = smov 16  }
  0x19   :  { %23 = dma.hbm_to_vmem [thread:$0]  %s4459_s0, 3072, %s18_s23, [#allocation3], %s3297_s25, %s3297_s25, %s3298_s26  }
  0x1a   :  { %s3299_s29 = smov [#allocation7]  }
  0x1b   :  { %s41_s30 = sshll.u32 %s3299_s29, 4  ;;  %s42_s30 = int_to_ptr.vmem [resolvable:$true] %s41_s30 }
  0x1c   :  { %s3255_s1 = scalar_lea.vmem %s42_s30, 23040  ;;  %p3260_p11 = scmp.lt.s32.totalorder %s42_s30, %s42_s30 }
  0x1d   :  { %p3256_p10 = scmp.ne.s32.totalorder %s42_s30, %s3255_s1  ;;  %p3261_p12 = scmp.lt.s32.totalorder %s3255_s1, %s3255_s1 }
  0x1f   :  { %p3262_p13 = por %p3261_p12, %p3260_p11 }
  0x21   :  { %p3263_p0 = pnand %p3262_p13, %p3256_p10 }
  0x23   :  { %3266 = shalt.err (!%p3263_p0)
}
  0x24   :  { %s3300_s5 = smov 128   ;;  %s3301_s6 = smov 8  }
  0x25   :  { %47 = dma.hbm_to_vmem [thread:$0]  %s4461_s2, 23040, %s42_s30, [#allocation6], %s3300_s5, %s3300_s5, %s3301_s6  }
  0x26   :  { %3287 = dma.done.wait [#allocation3], 3072  }
  0x27   :  { %3288 = vsyncadd [#allocation3], 4294964224 }
  0x28   :  { %3289 = dma.done.wait [#allocation6], 35328  }
  0x29   :  { %3290 = vsyncadd [#allocation6], 4294931968  ;;  %v3345_v0 = vld [vmem:[#allocation2 + $0xb0] sm:$0xff]  ;;  %s3302_s0 = smov 104   ;;  %s3303_s9 = smov 120   ;;  %v3353_v2 = vld [vmem:[#allocation2 + $0xb8] sm:$0xff]  ;;  %v131_v24 = vlaneseq }
  0x2a   :  { %v3347_v1 = vld [vmem:[#allocation2 + $0x30] sm:$0xff]  ;;  %253 = vrot.lane.b32.xlu1 %v3345_v0, %s3302_s0  ;;  %v3355_v3 = vld [vmem:[#allocation2 + $0x38] sm:$0xff]  ;;  %v3361_v4 = vld [vmem:[#allocation2 + $0x28] sm:$0xff]  ;;  %s3304_s2 = smov 112   ;;  %s3305_s10 = smov 96   ;;  %vm3308_vm6 = vmmov 0  }
  0x2b   :  { %89 = vrot.lane.b32.xlu0 %v3347_v1, %s3303_s9  ;;  %v3363_v5 = vld [vmem:[#allocation2 + $0x20] sm:$0xff]  ;;  %v3369_v6 = vld [vmem:[#allocation2 + $0xa8] sm:$0xff]  ;;  %v3377_v8 = vld [vmem:[#allocation2 + $0x18] sm:$0xff]  ;;  %v3510_v25 = vand.u32 127, %v131_v24  ;;  %vm1253_vm8 = vcmask 785408   ;;  %s3309_s13 = smov [#allocation8]  }
  0x2c   :  { %v3371_v7 = vld [vmem:[#allocation2 + $0xa0] sm:$0xff]  ;;  %v3379_v9 = vld [vmem:[#allocation2 + $0x10] sm:$0xff]  ;;  %v3385_v10 = vld [vmem:[#allocation2 + $0x98] sm:$0xff] }
  0x2d   :  { %v3387_v11 = vld [vmem:[#allocation2 + $0x90] sm:$0xff]  ;;  %v3393_v12 = vld [vmem:[#allocation2 + $0x8] sm:$0xff]  ;;  %v3395_v13 = vld [vmem:[#allocation2] sm:$0xff]  ;;  %4466 = vst [vmem:[#allocation12_spill] sm:$0xff] %v3510_v25  ;;  %vm133_vm0 = vcmp.lt.s32.totalorder %v3510_v25, 120  ;;  %vm279_vm1 = vcmp.lt.s32.totalorder %v3510_v25, 104 }
  0x2e   :  { %277 = vrot.lane.b32.xlu1 %v3353_v2, %s3302_s0  ;;  %v3401_v14 = vld [vmem:[#allocation2 + $0x88] sm:$0xff]  ;;  %v3403_v15 = vld [vmem:[#allocation2 + $0x80] sm:$0xff]  ;;  %v3409_v16 = vld [vmem:[#allocation2 + $0x78] sm:$0xff]  ;;  %vm206_vm2 = vcmp.lt.s32.totalorder %v3510_v25, 112  ;;  %vm352_vm3 = vcmp.lt.s32.totalorder %v3510_v25, 96 }
  0x2f   :  { %113 = vrot.lane.b32.xlu0 %v3355_v3, %s3303_s9  ;;  %v3411_v17 = vld [vmem:[#allocation2 + $0x70] sm:$0xff]  ;;  %v3417_v18 = vld [vmem:[#allocation2 + $0x68] sm:$0xff]  ;;  %v3419_v19 = vld [vmem:[#allocation2 + $0x60] sm:$0xff] }
  0x30   :  { %v3425_v20 = vld [vmem:[#allocation2 + $0x58] sm:$0xff]  ;;  %v3427_v21 = vld [vmem:[#allocation2 + $0x50] sm:$0xff]  ;;  %v3433_v22 = vld [vmem:[#allocation2 + $0x48] sm:$0xff] }
  0x31   :  { %v3435_v23 = vld [vmem:[#allocation2 + $0x40] sm:$0xff] }
  0x32   :  { %111 = vrot.lane.b32.xlu1 %v3361_v4, %s3303_s9 }
  0x33   :  { %87 = vrot.lane.b32.xlu0 %v3363_v5, %s3303_s9 }
  0x36   :  { %275 = vrot.lane.b32.xlu1 %v3369_v6, %s3302_s0 }
  0x37   :  { %251 = vrot.lane.b32.xlu0 %v3371_v7, %s3302_s0 }
  0x3a   :  { %109 = vrot.lane.b32.xlu1 %v3377_v8, %s3303_s9 }
  0x3b   :  { %85 = vrot.lane.b32.xlu0 %v3379_v9, %s3303_s9 }
  0x3e   :  { %273 = vrot.lane.b32.xlu1 %v3385_v10, %s3302_s0 }
  0x3f   :  { %249 = vrot.lane.b32.xlu0 %v3387_v11, %s3302_s0 }
  0x42   :  { %107 = vrot.lane.b32.xlu1 %v3393_v12, %s3303_s9 }
  0x43   :  { %83 = vrot.lane.b32.xlu0 %v3395_v13, %s3303_s9 }
  0x46   :  { %271 = vrot.lane.b32.xlu1 %v3401_v14, %s3302_s0 }
  0x47   :  { %247 = vrot.lane.b32.xlu0 %v3403_v15, %s3302_s0 }
  0x4a   :  { %269 = vrot.lane.b32.xlu1 %v3409_v16, %s3302_s0 }
  0x4b   :  { %245 = vrot.lane.b32.xlu0 %v3411_v17, %s3302_s0 }
  0x4e   :  { %267 = vrot.lane.b32.xlu1 %v3417_v18, %s3302_s0 }
  0x4f   :  { %243 = vrot.lane.b32.xlu0 %v3419_v19, %s3302_s0 }
  0x52   :  { %265 = vrot.lane.b32.xlu1 %v3425_v20, %s3302_s0 }
  0x53   :  { %241 = vrot.lane.b32.xlu0 %v3427_v21, %s3302_s0 }
  0x56   :  { %263 = vrot.lane.b32.xlu1 %v3433_v22, %s3302_s0 }
  0x57   :  { %239 = vrot.lane.b32.xlu0 %v3435_v23, %s3302_s0 }
  0x5a   :  { %261 = vrot.lane.b32.xlu1 %v3355_v3, %s3302_s0 }
  0x5b   :  { %237 = vrot.lane.b32.xlu0 %v3347_v1, %s3302_s0 }
  0x5e   :  { %259 = vrot.lane.b32.xlu1 %v3361_v4, %s3302_s0 }
  0x5f   :  { %235 = vrot.lane.b32.xlu0 %v3363_v5, %s3302_s0 }
  0x62   :  { %257 = vrot.lane.b32.xlu1 %v3377_v8, %s3302_s0 }
  0x63   :  { %233 = vrot.lane.b32.xlu0 %v3379_v9, %s3302_s0 }
  0x66   :  { %255 = vrot.lane.b32.xlu1 %v3393_v12, %s3302_s0 }
  0x67   :  { %231 = vrot.lane.b32.xlu0 %v3395_v13, %s3302_s0 }
  0x6a   :  { %204 = vrot.lane.b32.xlu1 %v3353_v2, %s3304_s2 }
  0x6b   :  { %180 = vrot.lane.b32.xlu0 %v3345_v0, %s3304_s2 }
  0x6e   :  { %202 = vrot.lane.b32.xlu1 %v3369_v6, %s3304_s2 }
  0x6f   :  { %178 = vrot.lane.b32.xlu0 %v3371_v7, %s3304_s2 }
  0x72   :  { %200 = vrot.lane.b32.xlu1 %v3385_v10, %s3304_s2 }
  0x73   :  { %176 = vrot.lane.b32.xlu0 %v3387_v11, %s3304_s2 }
  0x76   :  { %198 = vrot.lane.b32.xlu1 %v3401_v14, %s3304_s2 }
  0x77   :  { %174 = vrot.lane.b32.xlu0 %v3403_v15, %s3304_s2 }
  0x7a   :  { %196 = vrot.lane.b32.xlu1 %v3409_v16, %s3304_s2 }
  0x7b   :  { %172 = vrot.lane.b32.xlu0 %v3411_v17, %s3304_s2 }
  0x7e   :  { %194 = vrot.lane.b32.xlu1 %v3417_v18, %s3304_s2 }
  0x7f   :  { %170 = vrot.lane.b32.xlu0 %v3419_v19, %s3304_s2 }
  0x82   :  { %192 = vrot.lane.b32.xlu1 %v3425_v20, %s3304_s2 }
  0x83   :  { %168 = vrot.lane.b32.xlu0 %v3427_v21, %s3304_s2 }
  0x86   :  { %190 = vrot.lane.b32.xlu1 %v3433_v22, %s3304_s2 }
  0x87   :  { %166 = vrot.lane.b32.xlu0 %v3435_v23, %s3304_s2 }
  0x8a   :  { %188 = vrot.lane.b32.xlu1 %v3355_v3, %s3304_s2 }
  0x8b   :  { %164 = vrot.lane.b32.xlu0 %v3347_v1, %s3304_s2 }
  0x8e   :  { %350 = vrot.lane.b32.xlu1 %v3353_v2, %s3305_s10 }
  0x8f   :  { %326 = vrot.lane.b32.xlu0 %v3345_v0, %s3305_s10 }
  0x92   :  { %186 = vrot.lane.b32.xlu1 %v3361_v4, %s3304_s2 }
  0x93   :  { %162 = vrot.lane.b32.xlu0 %v3363_v5, %s3304_s2 }
  0x96   :  { %348 = vrot.lane.b32.xlu1 %v3369_v6, %s3305_s10 }
  0x97   :  { %324 = vrot.lane.b32.xlu0 %v3371_v7, %s3305_s10 }
  0x9a   :  { %184 = vrot.lane.b32.xlu1 %v3377_v8, %s3304_s2 }
  0x9b   :  { %160 = vrot.lane.b32.xlu0 %v3379_v9, %s3304_s2 }
  0x9c   :  { %v254_v26 = vpop.permute.xlu1 %253 }
  0x9d   :  { %v90_v27 = vpop.permute.xlu0 %89 }
  0x9e   :  { %346 = vrot.lane.b32.xlu1 %v3385_v10, %s3305_s10 }
  0x9f   :  { %322 = vrot.lane.b32.xlu0 %v3387_v11, %s3305_s10 }
  0xa0   :  { %v278_v28 = vpop.permute.xlu1 %277 }
  0xa1   :  { %v114_v29 = vpop.permute.xlu0 %113  ;;  %v303_v31 = vsel %vm279_vm1, %v278_v28, %v254_v26  ;;  %v291_v33 = vsel %vm279_vm1, %v254_v26, %v278_v28 }
  0xa2   :  { %v149_v30 = vsel %vm133_vm0, %v114_v29, %v90_v27  ;;  %v137_v32 = vsel %vm133_vm0, %v90_v27, %v114_v29  ;;  %682 = vmatprep.subr.mxu1 %v303_v31  ;;  %182 = vrot.lane.b32.xlu1 %v3393_v12, %s3304_s2 }
  0xa3   :  { %473 = vmatprep.subr.mxu0 %v149_v30  ;;  %158 = vrot.lane.b32.xlu0 %v3395_v13, %s3304_s2 }
  0xa4   :  { %474 = vmatpush1.msra.mxu0 %v137_v32  ;;  %683 = vmatpush1.msra.mxu1 %v291_v33  ;;  %v112_v34 = vpop.permute.xlu1 %111 }
  0xa5   :  { %v88_v35 = vpop.permute.xlu0 %87 }
  0xa6   :  { %v148_v36 = vsel %vm133_vm0, %v112_v34, %v88_v35  ;;  %v136_v37 = vsel %vm133_vm0, %v88_v35, %v112_v34  ;;  %344 = vrot.lane.b32.xlu1 %v3401_v14, %s3305_s10 }
  0xa7   :  { %475 = vmatprep.subr.mxu0 %v148_v36  ;;  %320 = vrot.lane.b32.xlu0 %v3403_v15, %s3305_s10 }
  0xa8   :  { %476 = vmatpush1.msra.mxu0 %v136_v37  ;;  %v276_v38 = vpop.permute.xlu1 %275 }
  0xa9   :  { %v252_v39 = vpop.permute.xlu0 %251 }
  0xaa   :  { %v302_v40 = vsel %vm279_vm1, %v276_v38, %v252_v39  ;;  %v290_v41 = vsel %vm279_vm1, %v252_v39, %v276_v38  ;;  %129 = vrot.lane.b32.xlu1 %v3353_v2, %s3303_s9  ;;  %v378_v38 = vld [vmem:[#allocation5 + $0x8] sm:$0xff] }
  0xab   :  { %684 = vmatprep.subr.mxu1 %v302_v40  ;;  %105 = vrot.lane.b32.xlu0 %v3345_v0, %s3303_s9 }
  0xac   :  { %685 = vmatpush1.msra.mxu1 %v290_v41  ;;  %v110_v42 = vpop.permute.xlu1 %109  ;;  %537 = vmatprep.mubr.f32.mxu0 %v378_v38 }
  0xad   :  { %v86_v43 = vpop.permute.xlu0 %85 }
  0xae   :  { %v147_v44 = vsel %vm133_vm0, %v110_v42, %v86_v43  ;;  %v135_v45 = vsel %vm133_vm0, %v86_v43, %v110_v42  ;;  %342 = vrot.lane.b32.xlu1 %v3409_v16, %s3305_s10 }
  0xaf   :  { %477 = vmatprep.subr.mxu0 %v147_v44  ;;  %318 = vrot.lane.b32.xlu0 %v3411_v17, %s3305_s10 }
  0xb0   :  { %478 = vmatpush1.msra.mxu0 %v135_v45  ;;  %v274_v46 = vpop.permute.xlu1 %273 }
  0xb1   :  { %v250_v47 = vpop.permute.xlu0 %249 }
  0xb2   :  { %v301_v48 = vsel %vm279_vm1, %v274_v46, %v250_v47  ;;  %v289_v49 = vsel %vm279_vm1, %v250_v47, %v274_v46  ;;  %127 = vrot.lane.b32.xlu1 %v3369_v6, %s3303_s9 }
  0xb3   :  { %686 = vmatprep.subr.mxu1 %v301_v48  ;;  %103 = vrot.lane.b32.xlu0 %v3371_v7, %s3303_s9 }
  0xb4   :  { %687 = vmatpush1.msra.mxu1 %v289_v49  ;;  %v108_v50 = vpop.permute.xlu1 %107 }
  0xb5   :  { %v84_v51 = vpop.permute.xlu0 %83 }
  0xb6   :  { %v146_v52 = vsel %vm133_vm0, %v108_v50, %v84_v51  ;;  %v134_v53 = vsel %vm133_vm0, %v84_v51, %v108_v50  ;;  %340 = vrot.lane.b32.xlu1 %v3417_v18, %s3305_s10  ;;  %v3306_v50 = vmov 1.0  }
  0xb7   :  { %479 = vmatprep.subr.mxu0 %v146_v52  ;;  %316 = vrot.lane.b32.xlu0 %v3419_v19, %s3305_s10 }
  0xb8   :  { %480 = vmatpush1.msra.mxu0 %v134_v53  ;;  %v272_v54 = vpop.permute.xlu1 %271 }
  0xb9   :  { %v248_v55 = vpop.permute.xlu0 %247  ;;  %481 = vmatprep.subr.mxu0 %v3353_v2 }
  0xba   :  { %v300_v56 = vsel %vm279_vm1, %v272_v54, %v248_v55  ;;  %v288_v57 = vsel %vm279_vm1, %v248_v55, %v272_v54  ;;  %482 = vmatpush1.msra.mxu0 %v3345_v0  ;;  %125 = vrot.lane.b32.xlu1 %v3385_v10, %s3303_s9 }
  0xbb   :  { %688 = vmatprep.subr.mxu1 %v300_v56  ;;  %101 = vrot.lane.b32.xlu0 %v3387_v11, %s3303_s9 }
  0xbc   :  { %689 = vmatpush1.msra.mxu1 %v288_v57  ;;  %v270_v58 = vpop.permute.xlu1 %269  ;;  %483 = vmatprep.subr.mxu0 %v3369_v6 }
  0xbd   :  { %v246_v59 = vpop.permute.xlu0 %245  ;;  %484 = vmatpush1.msra.mxu0 %v3371_v7 }
  0xbe   :  { %v299_v60 = vsel %vm279_vm1, %v270_v58, %v246_v59  ;;  %v287_v61 = vsel %vm279_vm1, %v246_v59, %v270_v58  ;;  %485 = vmatprep.subr.mxu0 %v3385_v10  ;;  %338 = vrot.lane.b32.xlu1 %v3425_v20, %s3305_s10 }
  0xbf   :  { %690 = vmatprep.subr.mxu1 %v299_v60  ;;  %314 = vrot.lane.b32.xlu0 %v3427_v21, %s3305_s10 }
  0xc0   :  { %691 = vmatpush1.msra.mxu1 %v287_v61  ;;  %v268_v62 = vpop.permute.xlu1 %267  ;;  %486 = vmatpush1.msra.mxu0 %v3387_v11 }
  0xc1   :  { %v244_v63 = vpop.permute.xlu0 %243  ;;  %487 = vmatprep.subr.mxu0 %v3401_v14 }
  0xc2   :  { %v298_v0 = vsel %vm279_vm1, %v268_v62, %v244_v63  ;;  %v286_v2 = vsel %vm279_vm1, %v244_v63, %v268_v62  ;;  %488 = vmatpush1.msra.mxu0 %v3403_v15  ;;  %123 = vrot.lane.b32.xlu1 %v3401_v14, %s3303_s9 }
  0xc3   :  { %692 = vmatprep.subr.mxu1 %v298_v0  ;;  %99 = vrot.lane.b32.xlu0 %v3403_v15, %s3303_s9 }
  0xc4   :  { %693 = vmatpush1.msra.mxu1 %v286_v2  ;;  %v266_v6 = vpop.permute.xlu1 %265  ;;  %489 = vmatprep.subr.mxu0 %v3409_v16 }
  0xc5   :  { %v242_v7 = vpop.permute.xlu0 %241  ;;  %490 = vmatpush1.msra.mxu0 %v3411_v17 }
  0xc6   :  { %v297_v10 = vsel %vm279_vm1, %v266_v6, %v242_v7  ;;  %v285_v11 = vsel %vm279_vm1, %v242_v7, %v266_v6  ;;  %491 = vmatprep.subr.mxu0 %v3417_v18  ;;  %336 = vrot.lane.b32.xlu1 %v3433_v22, %s3305_s10 }
  0xc7   :  { %694 = vmatprep.subr.mxu1 %v297_v10  ;;  %312 = vrot.lane.b32.xlu0 %v3435_v23, %s3305_s10 }
  0xc8   :  { %695 = vmatpush1.msra.mxu1 %v285_v11  ;;  %v264_v14 = vpop.permute.xlu1 %263  ;;  %492 = vmatpush1.msra.mxu0 %v3419_v19 }
  0xc9   :  { %v240_v15 = vpop.permute.xlu0 %239  ;;  %493 = vmatprep.subr.mxu0 %v3425_v20 }
  0xca   :  { %v296_v26 = vsel %vm279_vm1, %v264_v14, %v240_v15  ;;  %v284_v27 = vsel %vm279_vm1, %v240_v15, %v264_v14  ;;  %494 = vmatpush1.msra.mxu0 %v3427_v21  ;;  %121 = vrot.lane.b32.xlu1 %v3409_v16, %s3303_s9 }
  0xcb   :  { %696 = vmatprep.subr.mxu1 %v296_v26  ;;  %97 = vrot.lane.b32.xlu0 %v3411_v17, %s3303_s9 }
  0xcc   :  { %697 = vmatpush1.msra.mxu1 %v284_v27  ;;  %v262_v28 = vpop.permute.xlu1 %261  ;;  %495 = vmatprep.subr.mxu0 %v3433_v22 }
  0xcd   :  { %v238_v29 = vpop.permute.xlu0 %237  ;;  %496 = vmatpush1.msra.mxu0 %v3435_v23 }
  0xce   :  { %v295_v30 = vsel %vm279_vm1, %v262_v28, %v238_v29  ;;  %v283_v31 = vsel %vm279_vm1, %v238_v29, %v262_v28  ;;  %497 = vmatprep.subr.mxu0 %v3355_v3  ;;  %334 = vrot.lane.b32.xlu1 %v3355_v3, %s3305_s10 }
  0xcf   :  { %698 = vmatprep.subr.mxu1 %v295_v30  ;;  %310 = vrot.lane.b32.xlu0 %v3347_v1, %s3305_s10 }
  0xd0   :  { %699 = vmatpush1.msra.mxu1 %v283_v31  ;;  %v260_v16 = vpop.permute.xlu1 %259  ;;  %498 = vmatpush1.msra.mxu0 %v3347_v1 }
  0xd1   :  { %v236_v17 = vpop.permute.xlu0 %235  ;;  %499 = vmatprep.subr.mxu0 %v3361_v4 }
  0xd2   :  { %v294_v32 = vsel %vm279_vm1, %v260_v16, %v236_v17  ;;  %v282_v33 = vsel %vm279_vm1, %v236_v17, %v260_v16  ;;  %500 = vmatpush1.msra.mxu0 %v3363_v5  ;;  %119 = vrot.lane.b32.xlu1 %v3417_v18, %s3303_s9 }
  0xd3   :  { %700 = vmatprep.subr.mxu1 %v294_v32  ;;  %95 = vrot.lane.b32.xlu0 %v3419_v19, %s3303_s9 }
  0xd4   :  { %701 = vmatpush1.msra.mxu1 %v282_v33  ;;  %v258_v3 = vpop.permute.xlu1 %257  ;;  %501 = vmatprep.subr.mxu0 %v3377_v8 }
  0xd5   :  { %v234_v1 = vpop.permute.xlu0 %233  ;;  %502 = vmatpush1.msra.mxu0 %v3379_v9 }
  0xd6   :  { %v293_v34 = vsel %vm279_vm1, %v258_v3, %v234_v1  ;;  %v281_v35 = vsel %vm279_vm1, %v234_v1, %v258_v3  ;;  %503 = vmatprep.subr.mxu0 %v3393_v12  ;;  %332 = vrot.lane.b32.xlu1 %v3361_v4, %s3305_s10  ;;  %v380_v4 = vld [vmem:[#allocation5 + $0x18] sm:$0xff] }
  0xd7   :  { %702 = vmatprep.subr.mxu1 %v293_v34  ;;  %308 = vrot.lane.b32.xlu0 %v3363_v5, %s3305_s10 }
  0xd8   :  { %703 = vmatpush1.msra.mxu1 %v281_v35  ;;  %v256_v18 = vpop.permute.xlu1 %255  ;;  %504 = vmatpush1.msra.mxu0 %v3395_v13 }
  0xd9   :  { %v232_v19 = vpop.permute.xlu0 %231  ;;  %746 = vmatprep.mubr.f32.mxu1 %v380_v4 }
  0xda   :  { %v292_v36 = vsel %vm279_vm1, %v256_v18, %v232_v19  ;;  %v280_v37 = vsel %vm279_vm1, %v232_v19, %v256_v18  ;;  %117 = vrot.lane.b32.xlu1 %v3425_v20, %s3303_s9 }
  0xdb   :  { %704 = vmatprep.subr.mxu1 %v292_v36  ;;  %93 = vrot.lane.b32.xlu0 %v3427_v21, %s3303_s9 }
  0xdc   :  { %705 = vmatpush1.msra.mxu1 %v280_v37  ;;  %v205_v5 = vpop.permute.xlu1 %204 }
  0xdd   :  { %v181_v39 = vpop.permute.xlu0 %180 }
  0xde   :  { %v230_v40 = vsel %vm206_vm2, %v205_v5, %v181_v39  ;;  %v218_v41 = vsel %vm206_vm2, %v181_v39, %v205_v5  ;;  %330 = vrot.lane.b32.xlu1 %v3377_v8, %s3305_s10 }
  0xdf   :  { %706 = vmatprep.subr.mxu1 %v230_v40  ;;  %306 = vrot.lane.b32.xlu0 %v3379_v9, %s3305_s10 }
  0xe0   :  { %707 = vmatpush1.msra.mxu1 %v218_v41  ;;  %v203_v20 = vpop.permute.xlu1 %202 }
  0xe1   :  { %v179_v21 = vpop.permute.xlu0 %178 }
  0xe2   :  { %v229_v42 = vsel %vm206_vm2, %v203_v20, %v179_v21  ;;  %v217_v43 = vsel %vm206_vm2, %v179_v21, %v203_v20  ;;  %115 = vrot.lane.b32.xlu1 %v3433_v22, %s3303_s9 }
  0xe3   :  { %708 = vmatprep.subr.mxu1 %v229_v42  ;;  %91 = vrot.lane.b32.xlu0 %v3435_v23, %s3303_s9 }
  0xe4   :  { %709 = vmatpush1.msra.mxu1 %v217_v43  ;;  %v201_v8 = vpop.permute.xlu1 %200 }
  0xe5   :  { %v177_v44 = vpop.permute.xlu0 %176 }
  0xe6   :  { %v228_v9 = vsel %vm206_vm2, %v201_v8, %v177_v44  ;;  %v216_v45 = vsel %vm206_vm2, %v177_v44, %v201_v8  ;;  %328 = vrot.lane.b32.xlu1 %v3393_v12, %s3305_s10 }
  0xe7   :  { %710 = vmatprep.subr.mxu1 %v228_v9  ;;  %304 = vrot.lane.b32.xlu0 %v3395_v13, %s3305_s10 }
  0xe8   :  { %711 = vmatpush1.msra.mxu1 %v216_v45  ;;  %v199_v22 = vpop.permute.xlu1 %198 }
  0xe9   :  { %v175_v46 = vpop.permute.xlu0 %174 }
  0xea   :  { %v227_v23 = vsel %vm206_vm2, %v199_v22, %v175_v46  ;;  %v215_v47 = vsel %vm206_vm2, %v175_v46, %v199_v22 }
  0xeb   :  { %712 = vmatprep.subr.mxu1 %v227_v23 }
  0xec   :  { %713 = vmatpush1.msra.mxu1 %v215_v47  ;;  %v197_v48 = vpop.permute.xlu1 %196 }
  0xed   :  { %v173_v49 = vpop.permute.xlu0 %172  ;;  %714 = vmatprep.subr.mxu1 %v3306_v50 }
  0xee   :  { %v226_v12 = vsel %vm206_vm2, %v197_v48, %v173_v49  ;;  %v214_v13 = vsel %vm206_vm2, %v173_v49, %v197_v48  ;;  %715 = vmatpush2.msra.mxu1 %v3306_v50 }
  0xef   :  { %505 = vmatprep.subr.mxu0 %v226_v12  ;;  %716 = vmatprep.subr.mxu1 %v3306_v50 }
  0xf0   :  { %506 = vmatpush2.msra.mxu0 %v214_v13  ;;  %717 = vmatpush2.msra.mxu1 %v3306_v50  ;;  %v195_v51 = vpop.permute.xlu1 %194 }
  0xf1   :  { %v171_v52 = vpop.permute.xlu0 %170  ;;  %718 = vmatprep.subr.mxu1 %v3306_v50 }
  0xf2   :  { %v225_v53 = vsel %vm206_vm2, %v195_v51, %v171_v52  ;;  %v213_v54 = vsel %vm206_vm2, %v171_v52, %v195_v51  ;;  %719 = vmatpush2.msra.mxu1 %v3306_v50 }
  0xf3   :  { %507 = vmatprep.subr.mxu0 %v225_v53  ;;  %720 = vmatprep.subr.mxu1 %v3306_v50 }
  0xf4   :  { %508 = vmatpush2.msra.mxu0 %v213_v54  ;;  %721 = vmatpush2.msra.mxu1 %v3306_v50  ;;  %v193_v55 = vpop.permute.xlu1 %192 }
  0xf5   :  { %v169_v56 = vpop.permute.xlu0 %168 }
  0xf6   :  { %v224_v57 = vsel %vm206_vm2, %v193_v55, %v169_v56  ;;  %v212_v58 = vsel %vm206_vm2, %v169_v56, %v193_v55 }
  0xf7   :  { %509 = vmatprep.subr.mxu0 %v224_v57 }
  0xf8   :  { %510 = vmatpush2.msra.mxu0 %v212_v58  ;;  %v191_v59 = vpop.permute.xlu1 %190 }
  0xf9   :  { %v167_v60 = vpop.permute.xlu0 %166 }
  0xfa   :  { %v223_v61 = vsel %vm206_vm2, %v191_v59, %v167_v60  ;;  %v211_v62 = vsel %vm206_vm2, %v167_v60, %v191_v59 }
  0xfb   :  { %511 = vmatprep.subr.mxu0 %v223_v61 }
  0xfc   :  { %512 = vmatpush2.msra.mxu0 %v211_v62  ;;  %v189_v63 = vpop.permute.xlu1 %188 }
  0xfd   :  { %v165_v0 = vpop.permute.xlu0 %164 }
  0xfe   :  { %v222_v2 = vsel %vm206_vm2, %v189_v63, %v165_v0  ;;  %v210_v6 = vsel %vm206_vm2, %v165_v0, %v189_v63 }
  0xff   :  { %513 = vmatprep.subr.mxu0 %v222_v2 }
 0x100   :  { %514 = vmatpush2.msra.mxu0 %v210_v6  ;;  %v351_v7 = vpop.permute.xlu1 %350 }
 0x101   :  { %v327_v10 = vpop.permute.xlu0 %326 }
 0x102   :  { %v376_v11 = vsel %vm352_vm3, %v351_v7, %v327_v10  ;;  %v364_v14 = vsel %vm352_vm3, %v327_v10, %v351_v7 }
 0x103   :  { %722 = vmatprep.subr.mxu1 %v376_v11 }
 0x104   :  { %723 = vmatpush2.msra.mxu1 %v364_v14  ;;  %v187_v15 = vpop.permute.xlu1 %186 }
 0x105   :  { %v163_v26 = vpop.permute.xlu0 %162 }
 0x106   :  { %v221_v27 = vsel %vm206_vm2, %v187_v15, %v163_v26  ;;  %v209_v28 = vsel %vm206_vm2, %v163_v26, %v187_v15 }
 0x107   :  { %515 = vmatprep.subr.mxu0 %v221_v27 }
 0x108   :  { %516 = vmatpush2.msra.mxu0 %v209_v28  ;;  %v349_v29 = vpop.permute.xlu1 %348 }
 0x109   :  { %v325_v30 = vpop.permute.xlu0 %324 }
 0x10a   :  { %v375_v31 = vsel %vm352_vm3, %v349_v29, %v325_v30  ;;  %v363_v16 = vsel %vm352_vm3, %v325_v30, %v349_v29 }
 0x10b   :  { %724 = vmatprep.subr.mxu1 %v375_v31 }
 0x10c   :  { %725 = vmatpush2.msra.mxu1 %v363_v16  ;;  %v185_v17 = vpop.permute.xlu1 %184 }
 0x10d   :  { %v161_v32 = vpop.permute.xlu0 %160 }
 0x10e   :  { %v220_v33 = vsel %vm206_vm2, %v185_v17, %v161_v32  ;;  %v208_v3 = vsel %vm206_vm2, %v161_v32, %v185_v17 }
 0x10f   :  { %517 = vmatprep.subr.mxu0 %v220_v33 }
 0x110   :  { %518 = vmatpush2.msra.mxu0 %v208_v3  ;;  %v347_v1 = vpop.permute.xlu1 %346 }
 0x111   :  { %v323_v34 = vpop.permute.xlu0 %322 }
 0x112   :  { %v374_v35 = vsel %vm352_vm3, %v347_v1, %v323_v34  ;;  %v362_v18 = vsel %vm352_vm3, %v323_v34, %v347_v1 }
 0x113   :  { %726 = vmatprep.subr.mxu1 %v374_v35 }
 0x114   :  { %727 = vmatpush2.msra.mxu1 %v362_v18  ;;  %v183_v19 = vpop.permute.xlu1 %182 }
 0x115   :  { %v159_v36 = vpop.permute.xlu0 %158 }
 0x116   :  { %v219_v37 = vsel %vm206_vm2, %v183_v19, %v159_v36  ;;  %v207_v38 = vsel %vm206_vm2, %v159_v36, %v183_v19 }
 0x117   :  { %519 = vmatprep.subr.mxu0 %v219_v37 }
 0x118   :  { %520 = vmatpush2.msra.mxu0 %v207_v38  ;;  %v345_v4 = vpop.permute.xlu1 %344 }
 0x119   :  { %v321_v5 = vpop.permute.xlu0 %320 }
 0x11a   :  { %v373_v39 = vsel %vm352_vm3, %v345_v4, %v321_v5  ;;  %v361_v40 = vsel %vm352_vm3, %v321_v5, %v345_v4 }
 0x11b   :  { %728 = vmatprep.subr.mxu1 %v373_v39  ;;  %v377_v39 = vld [vmem:[#allocation5] sm:$0xff] }
 0x11c   :  { %729 = vmatpush2.msra.mxu1 %v361_v40  ;;  %v130_v41 = vpop.permute.xlu1 %129  ;;  %v382_v40 = vld [vmem:[#allocation5 + $0x28] sm:$0xff] }
 0x11d   :  { %v106_v20 = vpop.permute.xlu0 %105 }
 0x11e   :  { %v157_v21 = vsel %vm133_vm0, %v130_v41, %v106_v20  ;;  %v145_v42 = vsel %vm133_vm0, %v106_v20, %v130_v41 }
 0x11f   :  { %521 = vmatprep.subr.mxu0 %v157_v21 }
 0x120   :  { %522 = vmatpush2.msra.mxu0 %v145_v42  ;;  %v343_v43 = vpop.permute.xlu1 %342 }
 0x121   :  { %v319_v8 = vpop.permute.xlu0 %318 }
 0x122   :  { %v372_v44 = vsel %vm352_vm3, %v343_v43, %v319_v8  ;;  %v360_v9 = vsel %vm352_vm3, %v319_v8, %v343_v43  ;;  %v379_v43 = vld [vmem:[#allocation5 + $0x10] sm:$0xff]  ;;  %v381_v8 = vld [vmem:[#allocation5 + $0x20] sm:$0xff] }
 0x123   :  { %730 = vmatprep.subr.mxu1 %v372_v44  ;;  %v384_v44 = vld [vmem:[#allocation5 + $0x38] sm:$0xff] }
 0x124   :  { %731 = vmatpush2.msra.mxu1 %v360_v9  ;;  %v128_v45 = vpop.permute.xlu1 %127  ;;  %v386_v9 = vld [vmem:[#allocation5 + $0x48] sm:$0xff] }
 0x125   :  { %v104_v22 = vpop.permute.xlu0 %103 }
 0x126   :  { %v156_v46 = vsel %vm133_vm0, %v128_v45, %v104_v22  ;;  %v144_v23 = vsel %vm133_vm0, %v104_v22, %v128_v45  ;;  %v383_v45 = vld [vmem:[#allocation5 + $0x30] sm:$0xff]  ;;  %v385_v22 = vld [vmem:[#allocation5 + $0x40] sm:$0xff] }
 0x127   :  { %523 = vmatprep.subr.mxu0 %v156_v46  ;;  %v388_v46 = vld [vmem:[#allocation5 + $0x58] sm:$0xff] }
 0x128   :  { %524 = vmatpush2.msra.mxu0 %v144_v23  ;;  %v341_v47 = vpop.permute.xlu1 %340  ;;  %v390_v23 = vld [vmem:[#allocation5 + $0x68] sm:$0xff] }
 0x129   :  { %v317_v48 = vpop.permute.xlu0 %316 }
 0x12a   :  { %v371_v49 = vsel %vm352_vm3, %v341_v47, %v317_v48  ;;  %v359_v50 = vsel %vm352_vm3, %v317_v48, %v341_v47  ;;  %v387_v47 = vld [vmem:[#allocation5 + $0x50] sm:$0xff]  ;;  %v389_v48 = vld [vmem:[#allocation5 + $0x60] sm:$0xff] }
 0x12b   :  { %732 = vmatprep.subr.mxu1 %v371_v49  ;;  %v392_v49 = vld [vmem:[#allocation5 + $0x78] sm:$0xff] }
 0x12c   :  { %733 = vmatpush2.msra.mxu1 %v359_v50  ;;  %v126_v12 = vpop.permute.xlu1 %125  ;;  %v394_v50 = vld [vmem:[#allocation5 + $0x88] sm:$0xff] }
 0x12d   :  { %v102_v13 = vpop.permute.xlu0 %101 }
 0x12e   :  { %v155_v51 = vsel %vm133_vm0, %v126_v12, %v102_v13  ;;  %v143_v52 = vsel %vm133_vm0, %v102_v13, %v126_v12  ;;  %v391_v12 = vld [vmem:[#allocation5 + $0x70] sm:$0xff]  ;;  %v393_v13 = vld [vmem:[#allocation5 + $0x80] sm:$0xff] }
 0x12f   :  { %525 = vmatprep.subr.mxu0 %v155_v51  ;;  %v396_v51 = vld [vmem:[#allocation5 + $0x98] sm:$0xff] }
 0x130   :  { %526 = vmatpush2.msra.mxu0 %v143_v52  ;;  %v339_v53 = vpop.permute.xlu1 %338  ;;  %v398_v52 = vld [vmem:[#allocation5 + $0xa8] sm:$0xff] }
 0x131   :  { %v315_v54 = vpop.permute.xlu0 %314 }
 0x132   :  { %v370_v55 = vsel %vm352_vm3, %v339_v53, %v315_v54  ;;  %v358_v56 = vsel %vm352_vm3, %v315_v54, %v339_v53  ;;  %v395_v53 = vld [vmem:[#allocation5 + $0x90] sm:$0xff]  ;;  %v397_v54 = vld [vmem:[#allocation5 + $0xa0] sm:$0xff] }
 0x133   :  { %734 = vmatprep.subr.mxu1 %v370_v55  ;;  %v400_v55 = vld [vmem:[#allocation5 + $0xb8] sm:$0xff] }
 0x134   :  { %735 = vmatpush2.msra.mxu1 %v358_v56  ;;  %v124_v57 = vpop.permute.xlu1 %123  ;;  %v402_v56 = vld [vmem:[#allocation5 + $0xc8] sm:$0xff] }
 0x135   :  { %v100_v58 = vpop.permute.xlu0 %99 }
 0x136   :  { %v154_v59 = vsel %vm133_vm0, %v124_v57, %v100_v58  ;;  %v142_v60 = vsel %vm133_vm0, %v100_v58, %v124_v57  ;;  %v399_v57 = vld [vmem:[#allocation5 + $0xb0] sm:$0xff]  ;;  %v401_v58 = vld [vmem:[#allocation5 + $0xc0] sm:$0xff] }
 0x137   :  { %527 = vmatprep.subr.mxu0 %v154_v59  ;;  %v404_v59 = vld [vmem:[#allocation5 + $0xd8] sm:$0xff] }
 0x138   :  { %528 = vmatpush2.msra.mxu0 %v142_v60  ;;  %v337_v61 = vpop.permute.xlu1 %336  ;;  %v406_v60 = vld [vmem:[#allocation5 + $0xe8] sm:$0xff] }
 0x139   :  { %v313_v62 = vpop.permute.xlu0 %312 }
 0x13a   :  { %v369_v63 = vsel %vm352_vm3, %v337_v61, %v313_v62  ;;  %v357_v0 = vsel %vm352_vm3, %v313_v62, %v337_v61  ;;  %v403_v61 = vld [vmem:[#allocation5 + $0xd0] sm:$0xff]  ;;  %v405_v62 = vld [vmem:[#allocation5 + $0xe0] sm:$0xff] }
 0x13b   :  { %736 = vmatprep.subr.mxu1 %v369_v63  ;;  %v408_v63 = vld [vmem:[#allocation5 + $0xf8] sm:$0xff] }
 0x13c   :  { %737 = vmatpush2.msra.mxu1 %v357_v0  ;;  %v122_v2 = vpop.permute.xlu1 %121  ;;  %v410_v0 = vld [vmem:[#allocation5 + $0x108] sm:$0xff] }
 0x13d   :  { %v98_v6 = vpop.permute.xlu0 %97 }
 0x13e   :  { %v153_v7 = vsel %vm133_vm0, %v122_v2, %v98_v6  ;;  %v141_v10 = vsel %vm133_vm0, %v98_v6, %v122_v2  ;;  %v407_v2 = vld [vmem:[#allocation5 + $0xf0] sm:$0xff]  ;;  %v409_v6 = vld [vmem:[#allocation5 + $0x100] sm:$0xff] }
 0x13f   :  { %529 = vmatprep.subr.mxu0 %v153_v7  ;;  %v412_v7 = vld [vmem:[#allocation5 + $0x118] sm:$0xff] }
 0x140   :  { %530 = vmatpush2.msra.mxu0 %v141_v10  ;;  %v335_v11 = vpop.permute.xlu1 %334  ;;  %v414_v10 = vld [vmem:[#allocation5 + $0x128] sm:$0xff] }
 0x141   :  { %v311_v14 = vpop.permute.xlu0 %310 }
 0x142   :  { %v368_v15 = vsel %vm352_vm3, %v335_v11, %v311_v14  ;;  %v356_v26 = vsel %vm352_vm3, %v311_v14, %v335_v11  ;;  %v411_v11 = vld [vmem:[#allocation5 + $0x110] sm:$0xff]  ;;  %v413_v14 = vld [vmem:[#allocation5 + $0x120] sm:$0xff] }
 0x143   :  { %738 = vmatprep.subr.mxu1 %v368_v15  ;;  %v416_v15 = vld [vmem:[#allocation5 + $0x138] sm:$0xff] }
 0x144   :  { %739 = vmatpush2.msra.mxu1 %v356_v26  ;;  %v120_v27 = vpop.permute.xlu1 %119  ;;  %v418_v26 = vld [vmem:[#allocation5 + $0x148] sm:$0xff] }
 0x145   :  { %v96_v28 = vpop.permute.xlu0 %95 }
 0x146   :  { %v152_v29 = vsel %vm133_vm0, %v120_v27, %v96_v28  ;;  %v140_v30 = vsel %vm133_vm0, %v96_v28, %v120_v27  ;;  %v415_v27 = vld [vmem:[#allocation5 + $0x130] sm:$0xff]  ;;  %v417_v28 = vld [vmem:[#allocation5 + $0x140] sm:$0xff] }
 0x147   :  { %531 = vmatprep.subr.mxu0 %v152_v29  ;;  %v420_v29 = vld [vmem:[#allocation5 + $0x158] sm:$0xff] }
 0x148   :  { %532 = vmatpush2.msra.mxu0 %v140_v30  ;;  %v333_v31 = vpop.permute.xlu1 %332  ;;  %v422_v30 = vld [vmem:[#allocation5 + $0x168] sm:$0xff] }
 0x149   :  { %v309_v16 = vpop.permute.xlu0 %308 }
 0x14a   :  { %v367_v17 = vsel %vm352_vm3, %v333_v31, %v309_v16  ;;  %v355_v32 = vsel %vm352_vm3, %v309_v16, %v333_v31  ;;  %v419_v31 = vld [vmem:[#allocation5 + $0x150] sm:$0xff]  ;;  %v421_v16 = vld [vmem:[#allocation5 + $0x160] sm:$0xff] }
 0x14b   :  { %740 = vmatprep.subr.mxu1 %v367_v17  ;;  %v424_v17 = vld [vmem:[#allocation5 + $0x178] sm:$0xff] }
 0x14c   :  { %741 = vmatpush2.msra.mxu1 %v355_v32  ;;  %v118_v33 = vpop.permute.xlu1 %117  ;;  %v426_v32 = vld [vmem:[#allocation5 + $0x188] sm:$0xff] }
 0x14d   :  { %v94_v3 = vpop.permute.xlu0 %93 }
 0x14e   :  { %v151_v1 = vsel %vm133_vm0, %v118_v33, %v94_v3  ;;  %v139_v34 = vsel %vm133_vm0, %v94_v3, %v118_v33  ;;  %v423_v33 = vld [vmem:[#allocation5 + $0x170] sm:$0xff]  ;;  %v425_v3 = vld [vmem:[#allocation5 + $0x180] sm:$0xff] }
 0x14f   :  { %533 = vmatprep.subr.mxu0 %v151_v1  ;;  %v428_v1 = vld [vmem:[#allocation5 + $0x198] sm:$0xff] }
 0x150   :  { %534 = vmatpush2.msra.mxu0 %v139_v34  ;;  %v331_v35 = vpop.permute.xlu1 %330  ;;  %v430_v34 = vld [vmem:[#allocation5 + $0x1a8] sm:$0xff] }
 0x151   :  { %v307_v18 = vpop.permute.xlu0 %306 }
 0x152   :  { %v366_v19 = vsel %vm352_vm3, %v331_v35, %v307_v18  ;;  %v354_v36 = vsel %vm352_vm3, %v307_v18, %v331_v35  ;;  %v427_v35 = vld [vmem:[#allocation5 + $0x190] sm:$0xff]  ;;  %v429_v18 = vld [vmem:[#allocation5 + $0x1a0] sm:$0xff] }
 0x153   :  { %742 = vmatprep.subr.mxu1 %v366_v19  ;;  %v432_v19 = vld [vmem:[#allocation5 + $0x1b8] sm:$0xff] }
 0x154   :  { %743 = vmatpush2.msra.mxu1 %v354_v36  ;;  %v116_v37 = vpop.permute.xlu1 %115  ;;  %v434_v36 = vld [vmem:[#allocation5 + $0x1c8] sm:$0xff] }
 0x155   :  { %v92_v38 = vpop.permute.xlu0 %91 }
 0x156   :  { %v150_v4 = vsel %vm133_vm0, %v116_v37, %v92_v38  ;;  %v138_v5 = vsel %vm133_vm0, %v92_v38, %v116_v37  ;;  %v431_v37 = vld [vmem:[#allocation5 + $0x1b0] sm:$0xff]  ;;  %v433_v38 = vld [vmem:[#allocation5 + $0x1c0] sm:$0xff] }
 0x157   :  { %535 = vmatprep.subr.mxu0 %v150_v4  ;;  %v436_v4 = vld [vmem:[#allocation5 + $0x1d8] sm:$0xff] }
 0x158   :  { %536 = vmatpush2.msra.mxu0 %v138_v5  ;;  %v329_v41 = vpop.permute.xlu1 %328  ;;  %v438_v5 = vld [vmem:[#allocation5 + $0x1e8] sm:$0xff] }
 0x159   :  { %v305_v20 = vpop.permute.xlu0 %304  ;;  %538 = vmatmul.mubr.f32.vlgmr.msra.gmra.mxu0 %v377_v39  ;;  %v435_v39 = vld [vmem:[#allocation5 + $0x1d0] sm:$0xff] }
 0x15a   :  { %v365_v21 = vsel %vm352_vm3, %v329_v41, %v305_v20  ;;  %v353_v42 = vsel %vm352_vm3, %v305_v20, %v329_v41  ;;  %543 = vmatprep.mubr.f32.mxu0 %v382_v40  ;;  %v437_v40 = vld [vmem:[#allocation5 + $0x1e0] sm:$0xff]  ;;  %v440_v41 = vld [vmem:[#allocation5 + $0x1f8] sm:$0xff]  ;;  %v442_v20 = vld [vmem:[#allocation5 + $0x208] sm:$0xff] }
 0x15b   :  { %744 = vmatprep.subr.mxu1 %v365_v21  ;;  %v439_v21 = vld [vmem:[#allocation5 + $0x1f0] sm:$0xff] }
 0x15c   :  { %745 = vmatpush2.msra.mxu1 %v353_v42  ;;  %v441_v42 = vld [vmem:[#allocation5 + $0x200] sm:$0xff] }
 0x15d   :  { %747 = vmatmul.mubr.f32.vlgmr.msra.gmra.mxu1 %v379_v43  ;;  %544 = vmatmul.mubr.f32.gmra.mxu0 %v381_v8  ;;  %v444_v43 = vld [vmem:[#allocation5 + $0x218] sm:$0xff]  ;;  %v446_v8 = vld [vmem:[#allocation5 + $0x228] sm:$0xff] }
 0x15e   :  { %752 = vmatprep.mubr.f32.mxu1 %v384_v44  ;;  %549 = vmatprep.mubr.f32.mxu0 %v386_v9  ;;  %v443_v44 = vld [vmem:[#allocation5 + $0x210] sm:$0xff]  ;;  %v445_v9 = vld [vmem:[#allocation5 + $0x220] sm:$0xff] }
 0x161   :  { %753 = vmatmul.mubr.f32.gmra.mxu1 %v383_v45  ;;  %550 = vmatmul.mubr.f32.gmra.mxu0 %v385_v22  ;;  %v448_v45 = vld [vmem:[#allocation5 + $0x238] sm:$0xff]  ;;  %v450_v22 = vld [vmem:[#allocation5 + $0x248] sm:$0xff] }
 0x162   :  { %758 = vmatprep.mubr.f32.mxu1 %v388_v46  ;;  %555 = vmatprep.mubr.f32.mxu0 %v390_v23  ;;  %v447_v46 = vld [vmem:[#allocation5 + $0x230] sm:$0xff]  ;;  %v449_v23 = vld [vmem:[#allocation5 + $0x240] sm:$0xff] }
 0x165   :  { %759 = vmatmul.mubr.f32.gmra.mxu1 %v387_v47  ;;  %556 = vmatmul.mubr.f32.gmra.mxu0 %v389_v48  ;;  %v452_v47 = vld [vmem:[#allocation5 + $0x258] sm:$0xff]  ;;  %v454_v48 = vld [vmem:[#allocation5 + $0x268] sm:$0xff] }
 0x166   :  { %764 = vmatprep.mubr.f32.mxu1 %v392_v49  ;;  %561 = vmatprep.mubr.f32.mxu0 %v394_v50  ;;  %v451_v49 = vld [vmem:[#allocation5 + $0x250] sm:$0xff]  ;;  %v453_v50 = vld [vmem:[#allocation5 + $0x260] sm:$0xff] }
 0x169   :  { %765 = vmatmul.mubr.f32.gmra.mxu1 %v391_v12  ;;  %562 = vmatmul.mubr.f32.gmra.mxu0 %v393_v13  ;;  %v456_v12 = vld [vmem:[#allocation5 + $0x278] sm:$0xff]  ;;  %v458_v13 = vld [vmem:[#allocation5 + $0x288] sm:$0xff] }
 0x16a   :  { %770 = vmatprep.mubr.f32.mxu1 %v396_v51  ;;  %567 = vmatprep.mubr.f32.mxu0 %v398_v52  ;;  %v455_v51 = vld [vmem:[#allocation5 + $0x270] sm:$0xff]  ;;  %v457_v52 = vld [vmem:[#allocation5 + $0x280] sm:$0xff] }
 0x16d   :  { %771 = vmatmul.mubr.f32.gmra.mxu1 %v395_v53  ;;  %568 = vmatmul.mubr.f32.gmra.mxu0 %v397_v54  ;;  %v460_v53 = vld [vmem:[#allocation5 + $0x298] sm:$0xff]  ;;  %v462_v54 = vld [vmem:[#allocation5 + $0x2a8] sm:$0xff] }
 0x16e   :  { %776 = vmatprep.mubr.f32.mxu1 %v400_v55  ;;  %573 = vmatprep.mubr.f32.mxu0 %v402_v56  ;;  %v459_v55 = vld [vmem:[#allocation5 + $0x290] sm:$0xff]  ;;  %v461_v56 = vld [vmem:[#allocation5 + $0x2a0] sm:$0xff] }
 0x171   :  { %777 = vmatmul.mubr.f32.gmra.mxu1 %v399_v57  ;;  %574 = vmatmul.mubr.f32.gmra.mxu0 %v401_v58  ;;  %v464_v57 = vld [vmem:[#allocation5 + $0x2b8] sm:$0xff]  ;;  %v466_v58 = vld [vmem:[#allocation5 + $0x2c8] sm:$0xff] }
 0x172   :  { %782 = vmatprep.mubr.f32.mxu1 %v404_v59  ;;  %579 = vmatprep.mubr.f32.mxu0 %v406_v60  ;;  %v463_v59 = vld [vmem:[#allocation5 + $0x2b0] sm:$0xff]  ;;  %v465_v60 = vld [vmem:[#allocation5 + $0x2c0] sm:$0xff] }
 0x175   :  { %783 = vmatmul.mubr.f32.gmra.mxu1 %v403_v61  ;;  %580 = vmatmul.mubr.f32.gmra.mxu0 %v405_v62  ;;  %v468_v61 = vld [vmem:[#allocation5 + $0x2d8] sm:$0xff]  ;;  %v470_v62 = vld [vmem:[#allocation5 + $0x2e8] sm:$0xff] }
 0x176   :  { %788 = vmatprep.mubr.f32.mxu1 %v408_v63  ;;  %585 = vmatprep.mubr.f32.mxu0 %v410_v0  ;;  %v467_v63 = vld [vmem:[#allocation5 + $0x2d0] sm:$0xff]  ;;  %v469_v0 = vld [vmem:[#allocation5 + $0x2e0] sm:$0xff] }
 0x179   :  { %789 = vmatmul.mubr.f32.gmra.mxu1 %v407_v2  ;;  %586 = vmatmul.mubr.f32.gmra.mxu0 %v409_v6  ;;  %v472_v2 = vld [vmem:[#allocation5 + $0x2f8] sm:$0xff]  ;;  %v471_v6 = vld [vmem:[#allocation5 + $0x2f0] sm:$0xff] }
 0x17a   :  { %794 = vmatprep.mubr.f32.mxu1 %v412_v7  ;;  %591 = vmatprep.mubr.f32.mxu0 %v414_v10 }
 0x17d   :  { %795 = vmatmul.mubr.f32.gmra.mxu1 %v411_v11  ;;  %592 = vmatmul.mubr.f32.gmra.mxu0 %v413_v14 }
 0x17e   :  { %800 = vmatprep.mubr.f32.mxu1 %v416_v15  ;;  %597 = vmatprep.mubr.f32.mxu0 %v418_v26 }
 0x181   :  { %801 = vmatmul.mubr.f32.gmra.mxu1 %v415_v27  ;;  %598 = vmatmul.mubr.f32.gmra.mxu0 %v417_v28 }
 0x182   :  { %806 = vmatprep.mubr.f32.mxu1 %v420_v29  ;;  %603 = vmatprep.mubr.f32.mxu0 %v422_v30 }
 0x185   :  { %807 = vmatmul.mubr.f32.gmra.mxu1 %v419_v31  ;;  %604 = vmatmul.mubr.f32.gmra.mxu0 %v421_v16 }
 0x186   :  { %812 = vmatprep.mubr.f32.mxu1 %v424_v17  ;;  %609 = vmatprep.mubr.f32.mxu0 %v426_v32 }
 0x189   :  { %813 = vmatmul.mubr.f32.gmra.mxu1 %v423_v33  ;;  %610 = vmatmul.mubr.f32.gmra.mxu0 %v425_v3 }
 0x18a   :  { %818 = vmatprep.mubr.f32.mxu1 %v428_v1  ;;  %615 = vmatprep.mubr.f32.mxu0 %v430_v34 }
 0x18d   :  { %819 = vmatmul.mubr.f32.gmra.mxu1 %v427_v35  ;;  %616 = vmatmul.mubr.f32.gmra.mxu0 %v429_v18 }
 0x18e   :  { %824 = vmatprep.mubr.f32.mxu1 %v432_v19  ;;  %621 = vmatprep.mubr.f32.mxu0 %v434_v36 }
 0x191   :  { %825 = vmatmul.mubr.f32.gmra.mxu1 %v431_v37  ;;  %622 = vmatmul.mubr.f32.gmra.mxu0 %v433_v38 }
 0x192   :  { %830 = vmatprep.mubr.f32.mxu1 %v436_v4  ;;  %627 = vmatprep.mubr.f32.mxu0 %v438_v5 }
 0x195   :  { %831 = vmatmul.mubr.f32.gmra.mxu1 %v435_v39  ;;  %628 = vmatmul.mubr.f32.gmra.mxu0 %v437_v40 }
 0x196   :  { %836 = vmatprep.mubr.f32.mxu1 %v440_v41  ;;  %633 = vmatprep.mubr.f32.mxu0 %v442_v20 }
 0x199   :  { %837 = vmatmul.mubr.f32.gmra.mxu1 %v439_v21  ;;  %634 = vmatmul.mubr.f32.gmra.mxu0 %v441_v42 }
 0x19a   :  { %842 = vmatprep.mubr.f32.mxu1 %v444_v43  ;;  %639 = vmatprep.mubr.f32.mxu0 %v446_v8 }
 0x19d   :  { %843 = vmatmul.mubr.f32.gmra.mxu1 %v443_v44  ;;  %640 = vmatmul.mubr.f32.gmra.mxu0 %v445_v9 }
 0x19e   :  { %848 = vmatprep.mubr.f32.mxu1 %v448_v45  ;;  %645 = vmatprep.mubr.f32.mxu0 %v450_v22 }
 0x1a1   :  { %849 = vmatmul.mubr.f32.gmra.mxu1 %v447_v46  ;;  %646 = vmatmul.mubr.f32.gmra.mxu0 %v449_v23 }
 0x1a2   :  { %854 = vmatprep.mubr.f32.mxu1 %v452_v47  ;;  %651 = vmatprep.mubr.f32.mxu0 %v454_v48 }
 0x1a5   :  { %855 = vmatmul.mubr.f32.gmra.mxu1 %v451_v49  ;;  %652 = vmatmul.mubr.f32.gmra.mxu0 %v453_v50 }
 0x1a6   :  { %860 = vmatprep.mubr.f32.mxu1 %v456_v12  ;;  %657 = vmatprep.mubr.f32.mxu0 %v458_v13 }
 0x1a9   :  { %861 = vmatmul.mubr.f32.gmra.mxu1 %v455_v51  ;;  %658 = vmatmul.mubr.f32.gmra.mxu0 %v457_v52 }
 0x1aa   :  { %866 = vmatprep.mubr.f32.mxu1 %v460_v53  ;;  %663 = vmatprep.mubr.f32.mxu0 %v462_v54 }
 0x1ad   :  { %867 = vmatmul.mubr.f32.gmra.mxu1 %v459_v55  ;;  %664 = vmatmul.mubr.f32.gmra.mxu0 %v461_v56 }
 0x1ae   :  { %872 = vmatprep.mubr.f32.mxu1 %v464_v57  ;;  %669 = vmatprep.mubr.f32.mxu0 %v466_v58  ;;  %v3885_v57 = vadd.s32 128, %v3510_v25 }
 0x1b0   :  { %vm893_vm4 = vcmp.lt.s32.totalorder %v3885_v57, 224  ;;  %v1237_v57 = vld [vmem:[#allocation7 + $0x48] sm:$0xff] }
 0x1b1   :  { %873 = vmatmul.mubr.f32.gmra.mxu1 %v463_v59  ;;  %670 = vmatmul.mubr.f32.gmra.mxu0 %v465_v60 }
 0x1b2   :  { %878 = vmatprep.mubr.f32.mxu1 %v468_v61  ;;  %675 = vmatprep.mubr.f32.mxu0 %v470_v62  ;;  %v3889_v61 = vshrl.u32 %v131_v24, 7 }
 0x1b4   :  { %vm1018_vm5 = vcmp.lt.s32.totalorder %v3889_v61, 1  ;;  %v1235_v61 = vld [vmem:[#allocation7 + $0x38] sm:$0xff] }
 0x1b5   :  { %879 = vmatmul.mubr.f32.gmra.mxu1 %v467_v63  ;;  %676 = vmatmul.mubr.f32.gmra.mxu0 %v469_v0 }
 0x1b6   :  { %884 = vmatprep.mubr.f32.mxu1 %v472_v2 }
 0x1b9   :  { %885 = vmatmul.mubr.f32.gmra.mxu1 %v471_v6 }
 0x219   :  { %v539_v7 = vpop.f32.mrf.mxu0 }
 0x21b   :  { %v541_v10 = vpop.f32.mrf.mxu0 }
 0x21d   :  { %v748_v11 = vpop.f32.mrf.mxu1  ;;  %v3808_v14 = vpop.f32.mrf.mxu0 }
 0x21e   :  { %v749_v0 = vadd.f32 %v748_v11, %v539_v7 }
 0x21f   :  { %v750_v15 = vpop.f32.mrf.mxu1  ;;  %v547_v26 = vpop.f32.mrf.mxu0 }
 0x220   :  { %v751_v2 = vadd.f32 %v750_v15, %v541_v10  ;;  %v894_v15 = vmax.f32 %v749_v0, 0.0 }
 0x221   :  { %v754_v27 = vpop.f32.mrf.mxu1  ;;  %v3810_v28 = vpop.f32.mrf.mxu0 }
 0x223   :  { %v756_v29 = vpop.f32.mrf.mxu1  ;;  %v3812_v30 = vpop.f32.mrf.mxu0 }
 0x224   :  { %v757_v6 = vadd.f32 %v756_v29, %v547_v26  ;;  %v895_v26 = vmax.f32 %v751_v2, 0.0 }
 0x225   :  { %v3814_v31 = vpop.f32.mrf.mxu1  ;;  %v3816_v16 = vpop.f32.mrf.mxu0 }
 0x226   :  { %v897_v29 = vmax.f32 %v757_v6, 0.0 }
 0x227   :  { %v3818_v17 = vpop.f32.mrf.mxu1  ;;  %v3820_v32 = vpop.f32.mrf.mxu0 }
 0x229   :  { %v3822_v33 = vpop.f32.mrf.mxu1  ;;  %v3824_v3 = vpop.f32.mrf.mxu0 }
 0x22b   :  { %v3826_v1 = vpop.f32.mrf.mxu1  ;;  %v3828_v34 = vpop.f32.mrf.mxu0 }
 0x22d   :  { %v3830_v35 = vpop.f32.mrf.mxu1  ;;  %v3832_v18 = vpop.f32.mrf.mxu0 }
 0x22f   :  { %v3834_v19 = vpop.f32.mrf.mxu1  ;;  %v3836_v36 = vpop.f32.mrf.mxu0 }
 0x231   :  { %v3838_v37 = vpop.f32.mrf.mxu1  ;;  %v3840_v38 = vpop.f32.mrf.mxu0 }
 0x233   :  { %v3842_v4 = vpop.f32.mrf.mxu1  ;;  %v3844_v5 = vpop.f32.mrf.mxu0 }
 0x235   :  { %v3846_v39 = vpop.f32.mrf.mxu1  ;;  %v3848_v40 = vpop.f32.mrf.mxu0 }
 0x237   :  { %v3850_v41 = vpop.f32.mrf.mxu1  ;;  %v3852_v20 = vpop.f32.mrf.mxu0 }
 0x239   :  { %v3854_v21 = vpop.f32.mrf.mxu1  ;;  %v3856_v42 = vpop.f32.mrf.mxu0 }
 0x23b   :  { %v3858_v43 = vpop.f32.mrf.mxu1  ;;  %v3860_v8 = vpop.f32.mrf.mxu0 }
 0x23d   :  { %v3862_v44 = vpop.f32.mrf.mxu1  ;;  %v3864_v9 = vpop.f32.mrf.mxu0 }
 0x23f   :  { %v3866_v45 = vpop.f32.mrf.mxu1  ;;  %v3868_v22 = vpop.f32.mrf.mxu0 }
 0x241   :  { %v3870_v46 = vpop.f32.mrf.mxu1  ;;  %v3872_v23 = vpop.f32.mrf.mxu0 }
 0x243   :  { %v3874_v47 = vpop.f32.mrf.mxu1  ;;  %v3876_v48 = vpop.f32.mrf.mxu0 }
 0x244   :  { %4467 = vst [vmem:[#allocation13_spill] sm:$0xff] %v3876_v48 }
 0x245   :  { %v3878_v49 = vpop.f32.mrf.mxu1  ;;  %v605_v50 = vpop.f32.mrf.mxu0 }
 0x246   :  { %4468 = vst [vmem:[#allocation14_spill] sm:$0xff] %v3878_v49 }
 0x247   :  { %v3880_v12 = vpop.f32.mrf.mxu1  ;;  %v607_v13 = vpop.f32.mrf.mxu0 }
 0x248   :  { %4469 = vst [vmem:[#allocation15_spill] sm:$0xff] %v3880_v12 }
 0x249   :  { %v814_v51 = vpop.f32.mrf.mxu1  ;;  %v611_v52 = vpop.f32.mrf.mxu0 }
 0x24a   :  { %v3882_v53 = vadd.f32 %v814_v51, %v605_v50 }
 0x24b   :  { %v816_v54 = vpop.f32.mrf.mxu1  ;;  %v613_v55 = vpop.f32.mrf.mxu0 }
 0x24c   :  { %v817_v56 = vadd.f32 %v816_v54, %v607_v13  ;;  %v916_v58 = vmax.f32 %v3882_v53, 0.0  ;;  %v755_v13 = vadd.f32 %v754_v27, %v3808_v14 }
 0x24d   :  { %v820_v59 = vpop.f32.mrf.mxu1  ;;  %v617_v60 = vpop.f32.mrf.mxu0 }
 0x24e   :  { %v917_v62 = vmax.f32 %v817_v56, 0.0  ;;  %v821_v63 = vadd.f32 %v820_v59, %v611_v52  ;;  %v990_v54 = vrot.slane %v916_v58, 7  ;;  %v896_v0 = vmax.f32 %v755_v13, 0.0 }
 0x24f   :  { %v822_v50 = vpop.f32.mrf.mxu1  ;;  %v619_v51 = vpop.f32.mrf.mxu0 }
 0x250   :  { %v918_v12 = vmax.f32 %v821_v63, 0.0  ;;  %v823_v48 = vadd.f32 %v822_v50, %v613_v55  ;;  %v3898_v24 = vsel %vm893_vm4, %v917_v62, 0.0  ;;  %v763_v62 = vadd.f32 %v3818_v17, %v3812_v30 }
 0x251   :  { %v826_v25 = vpop.f32.mrf.mxu1  ;;  %v623_v49 = vpop.f32.mrf.mxu0  ;;  %v943_v17 = vsel %vm893_vm4, %v895_v26, 0.0 }
 0x252   :  { %v992_v7 = vrot.slane %v918_v12, 7  ;;  %v919_v10 = vmax.f32 %v823_v48, 0.0  ;;  %v827_v11 = vadd.f32 %v826_v25, %v617_v60  ;;  %v991_v12 = vrot.slane %v3898_v24, 7 }
 0x253   :  { %v828_v14 = vpop.f32.mrf.mxu1  ;;  %v625_v27 = vpop.f32.mrf.mxu0 }
 0x254   :  { %v967_v52 = vsel %vm893_vm4, %v919_v10, 0.0  ;;  %v920_v55 = vmax.f32 %v827_v11, 0.0  ;;  %v829_v56 = vadd.f32 %v828_v14, %v619_v51  ;;  %v1041_v59 = vsel %vm1018_vm5, %v990_v54, %v992_v7 }
 0x255   :  { %v993_v48 = vrot.slane %v967_v52, 7  ;;  %v832_v25 = vpop.f32.mrf.mxu1  ;;  %v629_v60 = vpop.f32.mrf.mxu0  ;;  %v3907_v63 = vmax.f32 %v894_v15, %v1041_v59  ;;  %v945_v51 = vsel %vm893_vm4, %v897_v29, 0.0  ;;  %v761_v54 = vadd.f32 %v3814_v31, %v3810_v28 }
 0x256   :  { %v994_v2 = vrot.slane %v920_v55, 7  ;;  %v921_v6 = vmax.f32 %v829_v56, 0.0  ;;  %v833_v50 = vadd.f32 %v832_v25, %v623_v49  ;;  %v899_v14 = vmax.f32 %v763_v62, 0.0 }
 0x257   :  { %v834_v10 = vpop.f32.mrf.mxu1  ;;  %1067 = vrot.lane.b32.xlu0 %v3907_v63, %s3301_s6  ;;  %v631_v30 = vpop.f32.mrf.mxu0  ;;  %v1042_v13 = vsel %vm1018_vm5, %v991_v12, %v993_v48  ;;  %v769_v28 = vadd.f32 %v3826_v1, %v3820_v32  ;;  %v767_v62 = vadd.f32 %v3822_v33, %v3816_v16  ;;  %v775_v32 = vadd.f32 %v3834_v19, %v3828_v34 }
 0x258   :  { %v969_v49 = vsel %vm893_vm4, %v921_v6, 0.0  ;;  %v922_v11 = vmax.f32 %v833_v50, 0.0  ;;  %v835_v15 = vadd.f32 %v834_v10, %v625_v27  ;;  %v3921_v29 = vmax.f32 %v943_v17, %v1042_v13 }
 0x259   :  { %v995_v31 = vrot.slane %v969_v49, 7  ;;  %v838_v52 = vpop.f32.mrf.mxu1  ;;  %v635_v55 = vpop.f32.mrf.mxu0  ;;  %v1039_v26 = vsel %vm1018_vm5, %v992_v7, %v994_v2  ;;  %v898_v27 = vmax.f32 %v761_v54, 0.0  ;;  %v947_v16 = vsel %vm893_vm4, %v899_v14, 0.0 }
 0x25a   :  { %v996_v56 = vrot.slane %v922_v11, 7  ;;  %v923_v59 = vmax.f32 %v835_v15, 0.0  ;;  %v839_v12 = vadd.f32 %v838_v52, %v629_v60  ;;  %1091 = vrot.lane.b32.xlu1 %v3921_v29, %s3301_s6  ;;  %v3929_v25 = vmax.f32 %v896_v0, %v1039_v26 }
 0x25b   :  { %v840_v1 = vpop.f32.mrf.mxu1  ;;  %v637_v6 = vpop.f32.mrf.mxu0  ;;  %v1040_v7 = vsel %vm1018_vm5, %v993_v48, %v995_v31  ;;  %v901_v33 = vmax.f32 %v769_v28, 0.0  ;;  %v773_v11 = vadd.f32 %v3830_v35, %v3824_v3  ;;  %v903_v15 = vmax.f32 %v775_v32, 0.0 }
 0x25c   :  { %v971_v60 = vsel %vm893_vm4, %v923_v59, 0.0  ;;  %v924_v50 = vmax.f32 %v839_v12, 0.0  ;;  %v841_v10 = vadd.f32 %v840_v1, %v631_v30  ;;  %1069 = vrot.lane.b32.xlu0 %v3929_v25, %s3301_s6  ;;  %v3941_v0 = vmax.f32 %v945_v51, %v1040_v7 }
 0x25d   :  { %v997_v34 = vrot.slane %v971_v60, 7  ;;  %v844_v19 = vpop.f32.mrf.mxu1  ;;  %v641_v54 = vpop.f32.mrf.mxu0  ;;  %v1037_v48 = vsel %vm1018_vm5, %v994_v2, %v996_v56  ;;  %v900_v51 = vmax.f32 %v767_v62, 0.0  ;;  %v949_v12 = vsel %vm893_vm4, %v901_v33, 0.0 }
 0x25e   :  { %v998_v17 = vrot.slane %v924_v50, 7  ;;  %v925_v13 = vmax.f32 %v841_v10, 0.0  ;;  %v845_v49 = vadd.f32 %v844_v19, %v635_v55  ;;  %1093 = vrot.lane.b32.xlu1 %v3941_v0, %s3301_s6  ;;  %v3949_v30 = vmax.f32 %v898_v27, %v1037_v48 }
 0x25f   :  { %v846_v14 = vpop.f32.mrf.mxu1  ;;  %v643_v28 = vpop.f32.mrf.mxu0  ;;  %v1038_v52 = vsel %vm1018_vm5, %v995_v31, %v997_v34  ;;  %v781_v3 = vadd.f32 %v3842_v4, %v3836_v36  ;;  %v902_v60 = vmax.f32 %v773_v11, 0.0  ;;  %v951_v50 = vsel %vm893_vm4, %v903_v15, 0.0 }
 0x260   :  { %v973_v2 = vsel %vm893_vm4, %v925_v13, 0.0  ;;  %v926_v26 = vmax.f32 %v845_v49, 0.0  ;;  %v847_v55 = vadd.f32 %v846_v14, %v637_v6  ;;  %1071 = vrot.lane.b32.xlu0 %v3949_v30, %s3301_s6  ;;  %v3959_v59 = vmax.f32 %v947_v16, %v1038_v52 }
 0x261   :  { %v999_v35 = vrot.slane %v973_v2, 7  ;;  %v850_v27 = vpop.f32.mrf.mxu1  ;;  %v647_v62 = vpop.f32.mrf.mxu0  ;;  %v1035_v31 = vsel %vm1018_vm5, %v996_v56, %v998_v17  ;;  %v779_v36 = vadd.f32 %v3838_v37, %v3832_v18  ;;  %v905_v48 = vmax.f32 %v781_v3, 0.0 }
 0x262   :  { %v1000_v32 = vrot.slane %v926_v26, 7  ;;  %v927_v1 = vmax.f32 %v847_v55, 0.0  ;;  %v851_v6 = vadd.f32 %v850_v27, %v641_v54  ;;  %1095 = vrot.lane.b32.xlu1 %v3959_v59, %s3301_s6  ;;  %v3969_v7 = vmax.f32 %v900_v51, %v1035_v31 }
 0x263   :  { %v852_v4 = vpop.f32.mrf.mxu1  ;;  %v649_v10 = vpop.f32.mrf.mxu0  ;;  %v1036_v56 = vsel %vm1018_vm5, %v997_v34, %v999_v35  ;;  %v787_v13 = vadd.f32 %v3850_v41, %v3844_v5  ;;  %v785_v52 = vadd.f32 %v3846_v39, %v3840_v38  ;;  %v793_v5 = vadd.f32 %v3858_v43, %v3852_v20 }
 0x264   :  { %v975_v16 = vsel %vm893_vm4, %v927_v1, 0.0  ;;  %v928_v33 = vmax.f32 %v851_v6, 0.0  ;;  %v853_v19 = vadd.f32 %v852_v4, %v643_v28  ;;  %1073 = vrot.lane.b32.xlu0 %v3969_v7, %s3301_s6  ;;  %v3981_v54 = vmax.f32 %v949_v12, %v1036_v56 }
 0x265   :  { %v1001_v18 = vrot.slane %v975_v16, 7  ;;  %v856_v37 = vpop.f32.mrf.mxu1  ;;  %v653_v49 = vpop.f32.mrf.mxu0  ;;  %v1033_v34 = vsel %vm1018_vm5, %v998_v17, %v1000_v32  ;;  %v904_v28 = vmax.f32 %v779_v36, 0.0  ;;  %v953_v38 = vsel %vm893_vm4, %v905_v48, 0.0 }
 0x266   :  { %v1002_v51 = vrot.slane %v928_v33, 7  ;;  %v929_v11 = vmax.f32 %v853_v19, 0.0  ;;  %v857_v15 = vadd.f32 %v856_v37, %v647_v62  ;;  %1097 = vrot.lane.b32.xlu1 %v3981_v54, %s3301_s6  ;;  %v3989_v14 = vmax.f32 %v902_v60, %v1033_v34 }
 0x267   :  { %v858_v41 = vpop.f32.mrf.mxu1  ;;  %v655_v2 = vpop.f32.mrf.mxu0  ;;  %v1034_v17 = vsel %vm1018_vm5, %v999_v35, %v1001_v18  ;;  %v907_v39 = vmax.f32 %v787_v13, 0.0  ;;  %v906_v60 = vmax.f32 %v785_v52, 0.0  ;;  %v909_v36 = vmax.f32 %v793_v5, 0.0 }
 0x268   :  { %v977_v26 = vsel %vm893_vm4, %v929_v11, 0.0  ;;  %v930_v55 = vmax.f32 %v857_v15, 0.0  ;;  %v859_v12 = vadd.f32 %v858_v41, %v649_v10  ;;  %1075 = vrot.lane.b32.xlu0 %v3989_v14, %s3301_s6  ;;  %v4001_v3 = vmax.f32 %v951_v50, %v1034_v17 }
 0x269   :  { %v1003_v20 = vrot.slane %v977_v26, 7  ;;  %v862_v43 = vpop.f32.mrf.mxu1  ;;  %v659_v27 = vpop.f32.mrf.mxu0  ;;  %v1031_v35 = vsel %vm1018_vm5, %v1000_v32, %v1002_v51  ;;  %v791_v50 = vadd.f32 %v3854_v21, %v3848_v40  ;;  %v955_v48 = vsel %vm893_vm4, %v907_v39, 0.0 }
 0x26a   :  { %v1004_v62 = vrot.slane %v930_v55, 7  ;;  %v931_v31 = vmax.f32 %v859_v12, 0.0  ;;  %v863_v1 = vadd.f32 %v862_v43, %v653_v49  ;;  %1099 = vrot.lane.b32.xlu1 %v4001_v3, %s3301_s6  ;;  %v4009_v6 = vmax.f32 %v904_v28, %v1031_v35 }
 0x26b   :  { %v864_v4 = vpop.f32.mrf.mxu1  ;;  %v661_v10 = vpop.f32.mrf.mxu0  ;;  %v1032_v56 = vsel %vm1018_vm5, %v1001_v18, %v1003_v20  ;;  %v799_v40 = vadd.f32 %v3866_v45, %v3860_v8  ;;  %v908_v28 = vmax.f32 %v791_v50, 0.0  ;;  %v957_v52 = vsel %vm893_vm4, %v909_v36, 0.0 }
 0x26c   :  { %v979_v32 = vsel %vm893_vm4, %v931_v31, 0.0  ;;  %v932_v16 = vmax.f32 %v863_v1, 0.0  ;;  %v865_v33 = vadd.f32 %v864_v4, %v655_v2  ;;  %1077 = vrot.lane.b32.xlu0 %v4009_v6, %s3301_s6  ;;  %v4019_v19 = vmax.f32 %v953_v38, %v1032_v56 }
 0x26d   :  { %v1005_v21 = vrot.slane %v979_v32, 7  ;;  %v868_v13 = vpop.f32.mrf.mxu1  ;;  %v665_v37 = vpop.f32.mrf.mxu0  ;;  %v1029_v18 = vsel %vm1018_vm5, %v1002_v51, %v1004_v62  ;;  %v797_v8 = vadd.f32 %v3862_v44, %v3856_v42  ;;  %v911_v55 = vmax.f32 %v799_v40, 0.0 }
 0x26e   :  { %v1006_v49 = vrot.slane %v932_v16, 7  ;;  %v933_v34 = vmax.f32 %v865_v33, 0.0  ;;  %v869_v11 = vadd.f32 %v868_v13, %v659_v27  ;;  %1101 = vrot.lane.b32.xlu1 %v4019_v19, %s3301_s6  ;;  %v4029_v15 = vmax.f32 %v906_v60, %v1029_v18  ;;  %v1252_v13 = vld [vmem:[#allocation7 + $0xb8] sm:$0xff] }
 0x26f   :  { %v870_v45 = vpop.f32.mrf.mxu1  ;;  %v667_v5 = vpop.f32.mrf.mxu0  ;;  %v1030_v51 = vsel %vm1018_vm5, %v1003_v20, %v1005_v21  ;;  %v803_v12 = vadd.f32 %v3870_v46, %v3864_v9  ;;  %v910_v31 = vmax.f32 %v797_v8, 0.0  ;;  %v805_v1 = vadd.f32 %v3874_v47, %v3868_v22  ;;  %v4470_v18 = vld [vmem:[#allocation14_spill] sm:$0xff] }
 0x270   :  { %v981_v41 = vsel %vm893_vm4, %v933_v34, 0.0  ;;  %v934_v2 = vmax.f32 %v869_v11, 0.0  ;;  %v871_v17 = vadd.f32 %v870_v45, %v661_v10  ;;  %1079 = vrot.lane.b32.xlu0 %v4029_v15, %s3301_s6  ;;  %v4041_v26 = vmax.f32 %v955_v48, %v1030_v51  ;;  %v4471_v11 = vld [vmem:[#allocation13_spill] sm:$0xff] }
 0x271   :  { %v1007_v42 = vrot.slane %v981_v41, 7  ;;  %v874_v44 = vpop.f32.mrf.mxu1  ;;  %v671_v38 = vpop.f32.mrf.mxu0  ;;  %v1027_v39 = vsel %vm1018_vm5, %v1004_v62, %v1006_v49  ;;  %v3307_v10 = vmov 0.0   ;;  %v959_v22 = vsel %vm893_vm4, %v911_v55, 0.0 }
 0x272   :  { %v1008_v20 = vrot.slane %v934_v2, 7  ;;  %v935_v43 = vmax.f32 %v871_v17, 0.0  ;;  %v875_v27 = vadd.f32 %v874_v44, %v665_v37  ;;  %1103 = vrot.lane.b32.xlu1 %v4041_v26, %s3301_s6  ;;  %v4049_v35 = vmax.f32 %v908_v28, %v1027_v39  ;;  %2781 = vmatprep.subr.mxu0 %v3307_v10  ;;  %v4472_v28 = vld [vmem:[#allocation15_spill] sm:$0xff] }
 0x273   :  { %v876_v60 = vpop.f32.mrf.mxu1  ;;  %v673_v9 = vpop.f32.mrf.mxu0  ;;  %v1028_v46 = vsel %vm1018_vm5, %v1005_v21, %v1007_v42  ;;  %v912_v47 = vmax.f32 %v803_v12, 0.0  ;;  %2808 = vmatprep.subr.mxu1 %v3307_v10  ;;  %v913_v37 = vmax.f32 %v805_v1, 0.0  ;;  %v809_v34 = vadd.f32 %v4470_v18, %v3872_v23  ;;  %2782 = vmatpush3.msra.mxu0 %v1252_v13  ;;  %v1238_v13 = vld [vmem:[#allocation7 + $0x50] sm:$0xff] }
 0x274   :  { %v983_v62 = vsel %vm893_vm4, %v935_v43, 0.0  ;;  %v936_v50 = vmax.f32 %v875_v27, 0.0  ;;  %v877_v36 = vadd.f32 %v876_v60, %v667_v5  ;;  %1081 = vrot.lane.b32.xlu0 %v4049_v35, %s3301_s6  ;;  %v4059_v4 = vmax.f32 %v957_v52, %v1028_v46  ;;  %2783 = vmatprep.subr.mxu0 %v3307_v10 }
 0x275   :  { %v1009_v56 = vrot.slane %v983_v62, 7  ;;  %v880_v32 = vpop.f32.mrf.mxu1  ;;  %v1025_v16 = vsel %vm1018_vm5, %v1006_v49, %v1008_v20  ;;  %v811_v52 = vadd.f32 %v4472_v28, %v4471_v11  ;;  %v677_v8 = vpop.f32.mrf.mxu0  ;;  %v961_v39 = vsel %vm893_vm4, %v913_v37, 0.0  ;;  %v1248_v28 = vld [vmem:[#allocation7 + $0x98] sm:$0xff]  ;;  %2832 = vmatprep.mubr.msk.f32.mxu1 %vm3308_vm6, %v3307_v10  ;;  %2805 = vmatprep.mubr.msk.f32.mxu0 %vm3308_vm6, %v3307_v10 }
 0x276   :  { %v1010_v33 = vrot.slane %v936_v50, 7  ;;  %v937_v48 = vmax.f32 %v877_v36, 0.0  ;;  %v881_v40 = vadd.f32 %v880_v32, %v671_v38  ;;  %1105 = vrot.lane.b32.xlu1 %v4059_v4, %s3301_s6  ;;  %v4069_v21 = vmax.f32 %v910_v31, %v1025_v16  ;;  %v1251_v50 = vld [vmem:[#allocation7 + $0xb0] sm:$0xff]  ;;  %v1250_v36 = vld [vmem:[#allocation7 + $0xa8] sm:$0xff] }
 0x277   :  { %v882_v49 = vpop.f32.mrf.mxu1  ;;  %v1026_v45 = vsel %vm1018_vm5, %v1007_v42, %v1009_v56  ;;  %v914_v43 = vmax.f32 %v809_v34, 0.0  ;;  %v915_v27 = vmax.f32 %v811_v52, 0.0  ;;  %v679_v31 = vpop.f32.mrf.mxu0  ;;  %2784 = vmatpush3.msra.mxu0 %v1251_v50 }
 0x278   :  { %v985_v5 = vsel %vm893_vm4, %v937_v48, 0.0  ;;  %v938_v51 = vmax.f32 %v881_v40, 0.0  ;;  %v883_v41 = vadd.f32 %v882_v49, %v673_v9  ;;  %1083 = vrot.lane.b32.xlu0 %v4069_v21, %s3301_s6  ;;  %v4081_v2 = vmax.f32 %v959_v22, %v1026_v45  ;;  %v1239_v22 = vld [vmem:[#allocation7 + $0x58] sm:$0xff]  ;;  %2785 = vmatprep.subr.mxu0 %v3307_v10  ;;  %v1249_v40 = vld [vmem:[#allocation7 + $0xa0] sm:$0xff]  ;;  %v1247_v45 = vld [vmem:[#allocation7 + $0x90] sm:$0xff] }
 0x279   :  { %v1011_v23 = vrot.slane %v985_v5, 7  ;;  %v886_v17 = vpop.f32.mrf.mxu1  ;;  %v1023_v55 = vsel %vm1018_vm5, %v1008_v20, %v1010_v33  ;;  %2809 = vmatpush3.msra.mxu1 %v1239_v22  ;;  %v963_v37 = vsel %vm893_vm4, %v915_v27, 0.0  ;;  %2786 = vmatpush3.msra.mxu0 %v1250_v36  ;;  %v1246_v5 = vld [vmem:[#allocation7 + $0x88] sm:$0xff] }
 0x27a   :  { %v1012_v12 = vrot.slane %v938_v51, 7  ;;  %v939_v42 = vmax.f32 %v883_v41, 0.0  ;;  %v887_v44 = vadd.f32 %v886_v17, %v677_v8  ;;  %1107 = vrot.lane.b32.xlu1 %v4081_v2, %s3301_s6  ;;  %v4088_v38 = vmax.f32 %v912_v47, %v1023_v55  ;;  %2810 = vmatprep.subr.mxu1 %v3307_v10  ;;  %v1245_v51 = vld [vmem:[#allocation7 + $0x80] sm:$0xff]  ;;  %v1244_v41 = vld [vmem:[#allocation7 + $0x78] sm:$0xff]  ;;  %v1243_v17 = vld [vmem:[#allocation7 + $0x70] sm:$0xff] }
 0x27b   :  { %v888_v1 = vpop.f32.mrf.mxu1  ;;  %v1024_v60 = vsel %vm1018_vm5, %v1009_v56, %v1011_v23  ;;  %2787 = vmatprep.subr.mxu0 %v3307_v10  ;;  %2811 = vmatpush3.msra.mxu1 %v1238_v13  ;;  %v1232_v55 = vld [vmem:[#allocation7 + $0x20] sm:$0xff] }
 0x27c   :  { %v987_v20 = vsel %vm893_vm4, %v939_v42, 0.0  ;;  %v940_v9 = vmax.f32 %v887_v44, 0.0  ;;  %v889_v46 = vadd.f32 %v888_v1, %v679_v31  ;;  %1085 = vrot.lane.b32.xlu0 %v4088_v38, %s3301_s6  ;;  %v4098_v62 = vmax.f32 %v961_v39, %v1024_v60  ;;  %2788 = vmatpush3.msra.mxu0 %v1249_v40  ;;  %v1231_v42 = vld [vmem:[#allocation7 + $0x18] sm:$0xff]  ;;  %v1230_v44 = vld [vmem:[#allocation7 + $0x10] sm:$0xff]  ;;  %v1229_v39 = vld [vmem:[#allocation7 + $0x8] sm:$0xff] }
 0x27d   :  { %v1013_v47 = vrot.slane %v987_v20, 7  ;;  %v1021_v32 = vsel %vm1018_vm5, %v1010_v33, %v1012_v12  ;;  %2789 = vmatprep.subr.mxu0 %v3307_v10  ;;  %2812 = vmatprep.subr.mxu1 %v3307_v10  ;;  %v4473_v31 = vld [vmem:[#allocation12_spill] sm:$0xff]  ;;  %v1241_v60 = vld [vmem:[#allocation7 + $0x60] sm:$0xff] }
 0x27e   :  { %v1014_v56 = vrot.slane %v940_v9, 7  ;;  %v941_v16 = vmax.f32 %v889_v46, 0.0  ;;  %1109 = vrot.lane.b32.xlu1 %v4098_v62, %s3301_s6  ;;  %v4104_v48 = vmax.f32 %v914_v43, %v1021_v32  ;;  %2790 = vmatpush3.msra.mxu0 %v1248_v28  ;;  %v1228_v43 = vld [vmem:[#allocation7] sm:$0xff]  ;;  %vm1115_vm7 = vcmp.lt.s32.totalorder %v4473_v31, 8 }
 0x27f   :  { %v1022_v18 = vsel %vm1018_vm5, %v1011_v23, %v1013_v47  ;;  %2813 = vmatpush3.msra.mxu1 %v1237_v57  ;;  %2791 = vmatprep.subr.mxu0 %v3307_v10  ;;  %v1233_v23 = vld [vmem:[#allocation7 + $0x28] sm:$0xff]  ;;  %vm2539_vm9 = vcmp.lt.s32.totalorder %v4473_v31, 10 }
 0x280   :  { %v989_v33 = vsel %vm893_vm4, %v941_v16, 0.0  ;;  %1087 = vrot.lane.b32.xlu0 %v4104_v48, %s3301_s6  ;;  %v4116_v34 = vmax.f32 %v963_v37, %v1022_v18  ;;  %v1019_v11 = vsel %vm1018_vm5, %v1012_v12, %v1014_v56  ;;  %2814 = vmatprep.subr.mxu1 %v3307_v10  ;;  %v1242_v12 = vld [vmem:[#allocation7 + $0x68] sm:$0xff] }
 0x281   :  { %v1015_v52 = vrot.slane %v989_v33, 7  ;;  %v4123_v8 = vmax.f32 %v916_v58, %v1019_v11  ;;  %v1236_v58 = vld [vmem:[#allocation7 + $0x40] sm:$0xff]  ;;  %2792 = vmatpush3.msra.mxu0 %v1247_v45 }
 0x282   :  { %1111 = vrot.lane.b32.xlu1 %v4116_v34, %s3301_s6  ;;  %2815 = vmatpush3.msra.mxu1 %v1236_v58 }
 0x283   :  { %v1020_v49 = vsel %vm1018_vm5, %v1013_v47, %v1015_v52  ;;  %2793 = vmatprep.subr.mxu0 %v3307_v10  ;;  %2816 = vmatprep.subr.mxu1 %v3307_v10 }
 0x284   :  { %1089 = vrot.lane.b32.xlu0 %v4123_v8, %s3301_s6  ;;  %v4134_v53 = vmax.f32 %v3898_v24, %v1020_v49  ;;  %2794 = vmatpush3.msra.mxu0 %v1246_v5  ;;  %v1234_v24 = vld [vmem:[#allocation7 + $0x30] sm:$0xff] }
 0x285   :  { %2817 = vmatpush3.msra.mxu1 %v1235_v61  ;;  %2795 = vmatprep.subr.mxu0 %v3307_v10 }
 0x286   :  { %1113 = vrot.lane.b32.xlu1 %v4134_v53, %s3301_s6  ;;  %2796 = vmatpush3.msra.mxu0 %v1245_v51 }
 0x287   :  { %2818 = vmatprep.subr.mxu1 %v3307_v10  ;;  %2797 = vmatprep.subr.mxu0 %v3307_v10 }
 0x288   :  { %2819 = vmatpush3.msra.mxu1 %v1234_v24  ;;  %2798 = vmatpush3.msra.mxu0 %v1244_v41 }
 0x289   :  { %2820 = vmatprep.subr.mxu1 %v3307_v10  ;;  %2799 = vmatprep.subr.mxu0 %v3307_v10 }
 0x28a   :  { %2821 = vmatpush3.msra.mxu1 %v1233_v23  ;;  %2800 = vmatpush3.msra.mxu0 %v1243_v17 }
 0x28b   :  { %2822 = vmatprep.subr.mxu1 %v3307_v10  ;;  %2801 = vmatprep.subr.mxu0 %v3307_v10 }
 0x28c   :  { %2823 = vmatpush3.msra.mxu1 %v1232_v55  ;;  %2802 = vmatpush3.msra.mxu0 %v1242_v12 }
 0x28d   :  { %2824 = vmatprep.subr.mxu1 %v3307_v10  ;;  %2803 = vmatprep.subr.mxu0 %v3307_v10 }
 0x28e   :  { %2825 = vmatpush3.msra.mxu1 %v1231_v42  ;;  %2804 = vmatpush3.msra.mxu0 %v1241_v60 }
 0x28f   :  { %2826 = vmatprep.subr.mxu1 %v3307_v10  ;;  %2835 = vmatprep.subr.mxu0 %v3307_v10 }
 0x290   :  { %2827 = vmatpush3.msra.mxu1 %v1230_v44 }
 0x291   :  { %2828 = vmatprep.subr.mxu1 %v3307_v10 }
 0x292   :  { %2829 = vmatpush3.msra.mxu1 %v1229_v39 }
 0x293   :  { %2830 = vmatprep.subr.mxu1 %v3307_v10 }
 0x294   :  { %2831 = vmatpush3.msra.mxu1 %v1228_v43 }
 0x295   :  { %2862 = vmatprep.subr.mxu1 %v3307_v10 }
 0x2c9   :  { %v1068_v27 = vpop.permute.xlu0 %1067 }
 0x2cc   :  { %v1092_v1 = vpop.permute.xlu1 %1091 }
 0x2cd   :  { %v1116_v20 = vsel %vm1115_vm7, %v1068_v27, %v1092_v1  ;;  %v1128_v9 = vsel %vm1115_vm7, %v1092_v1, %v1068_v27 }
 0x2ce   :  { %v1140_v46 = vmax.f32 %v3907_v63, %v1128_v9  ;;  %v1141_v50 = vmax.f32 %v3921_v29, %v1116_v20  ;;  %v1070_v36 = vpop.permute.xlu0 %1069 }
 0x2d0   :  { %v1094_v22 = vpop.permute.xlu1 %1093  ;;  %1164 = vxpose.xlu0.b32.start [1/12] (short) (narrow) %v1140_v46, 120  ;;  %1196 = vxpose.xlu1.b32.start [1/12] (short) (narrow) %v1141_v50, 104 }
 0x2d1   :  { %v1117_v47 = vsel %vm1115_vm7, %v1070_v36, %v1094_v22  ;;  %v1129_v32 = vsel %vm1115_vm7, %v1094_v22, %v1070_v36 }
 0x2d2   :  { %v1142_v56 = vmax.f32 %v3929_v25, %v1129_v32  ;;  %v1143_v16 = vmax.f32 %v3941_v0, %v1117_v47  ;;  %v1072_v40 = vpop.permute.xlu0 %1071 }
 0x2d4   :  { %v1096_v63 = vpop.permute.xlu1 %1095  ;;  %1165 = vxpose.xlu0.b32.cont [2/12] (short) (narrow) %v1142_v56, 120  ;;  %1197 = vxpose.xlu1.b32.cont [2/12] (short) (narrow) %v1143_v16, 104 }
 0x2d5   :  { %v1118_v29 = vsel %vm1115_vm7, %v1072_v40, %v1096_v63  ;;  %v1130_v13 = vsel %vm1115_vm7, %v1096_v63, %v1072_v40 }
 0x2d6   :  { %v1144_v37 = vmax.f32 %v3949_v30, %v1130_v13  ;;  %v1145_v18 = vmax.f32 %v3959_v59, %v1118_v29  ;;  %v1074_v33 = vpop.permute.xlu0 %1073  ;;  %v1498_v13 = vld [vmem:[#allocation7 + $0x170] sm:$0xff] }
 0x2d8   :  { %v1098_v11 = vpop.permute.xlu1 %1097  ;;  %1166 = vxpose.xlu0.b32.cont [3/12] (short) (narrow) %v1144_v37, 120  ;;  %1198 = vxpose.xlu1.b32.cont [3/12] (short) (narrow) %v1145_v18, 104  ;;  %v1497_v37 = vld [vmem:[#allocation7 + $0x168] sm:$0xff]  ;;  %v1496_v18 = vld [vmem:[#allocation7 + $0x160] sm:$0xff] }
 0x2d9   :  { %v1119_v25 = vsel %vm1115_vm7, %v1074_v33, %v1098_v11  ;;  %v1131_v0 = vsel %vm1115_vm7, %v1098_v11, %v1074_v33  ;;  %v1412_v33 = vld [vmem:[#allocation7 + $0x118] sm:$0xff] }
 0x2da   :  { %v1146_v28 = vmax.f32 %v3969_v7, %v1131_v0  ;;  %v1147_v52 = vmax.f32 %v3981_v54, %v1119_v25  ;;  %v1076_v57 = vpop.permute.xlu0 %1075  ;;  %v1495_v11 = vld [vmem:[#allocation7 + $0x158] sm:$0xff] }
 0x2dc   :  { %v1100_v49 = vpop.permute.xlu1 %1099  ;;  %1167 = vxpose.xlu0.b32.cont [4/12] (short) (narrow) %v1146_v28, 120  ;;  %1199 = vxpose.xlu1.b32.cont [4/12] (short) (narrow) %v1147_v52, 104  ;;  %v1411_v28 = vld [vmem:[#allocation7 + $0x110] sm:$0xff] }
 0x2dd   :  { %v1120_v30 = vsel %vm1115_vm7, %v1076_v57, %v1100_v49  ;;  %v1132_v59 = vsel %vm1115_vm7, %v1100_v49, %v1076_v57  ;;  %v1494_v52 = vld [vmem:[#allocation7 + $0x150] sm:$0xff]  ;;  %v1410_v57 = vld [vmem:[#allocation7 + $0x108] sm:$0xff] }
 0x2de   :  { %v1148_v45 = vmax.f32 %v3989_v14, %v1132_v59  ;;  %v1149_v58 = vmax.f32 %v4001_v3, %v1120_v30  ;;  %v1078_v5 = vpop.permute.xlu0 %1077  ;;  %v1493_v49 = vld [vmem:[#allocation7 + $0x148] sm:$0xff] }
 0x2e0   :  { %v1102_v61 = vpop.permute.xlu1 %1101  ;;  %1168 = vxpose.xlu0.b32.cont [5/12] (short) (narrow) %v1148_v45, 120  ;;  %1200 = vxpose.xlu1.b32.cont [5/12] (short) (narrow) %v1149_v58, 104  ;;  %v1409_v45 = vld [vmem:[#allocation7 + $0x100] sm:$0xff] }
 0x2e1   :  { %v1121_v7 = vsel %vm1115_vm7, %v1078_v5, %v1102_v61  ;;  %v1133_v54 = vsel %vm1115_vm7, %v1102_v61, %v1078_v5  ;;  %v1492_v58 = vld [vmem:[#allocation7 + $0x140] sm:$0xff]  ;;  %v1408_v5 = vld [vmem:[#allocation7 + $0xf8] sm:$0xff] }
 0x2e2   :  { %v1150_v51 = vmax.f32 %v4009_v6, %v1133_v54  ;;  %v1151_v24 = vmax.f32 %v4019_v19, %v1121_v7  ;;  %v1080_v41 = vpop.permute.xlu0 %1079  ;;  %v1491_v61 = vld [vmem:[#allocation7 + $0x138] sm:$0xff] }
 0x2e4   :  { %v1104_v23 = vpop.permute.xlu1 %1103  ;;  %1169 = vxpose.xlu0.b32.cont [6/12] (short) (narrow) %v1150_v51, 120  ;;  %1201 = vxpose.xlu1.b32.cont [6/12] (short) (narrow) %v1151_v24, 104  ;;  %v1407_v51 = vld [vmem:[#allocation7 + $0xf0] sm:$0xff] }
 0x2e5   :  { %v1122_v14 = vsel %vm1115_vm7, %v1080_v41, %v1104_v23  ;;  %v1134_v3 = vsel %vm1115_vm7, %v1104_v23, %v1080_v41  ;;  %v1490_v24 = vld [vmem:[#allocation7 + $0x130] sm:$0xff]  ;;  %v1406_v41 = vld [vmem:[#allocation7 + $0xe8] sm:$0xff] }
 0x2e6   :  { %v1152_v17 = vmax.f32 %v4029_v15, %v1134_v3  ;;  %v1153_v55 = vmax.f32 %v4041_v26, %v1122_v14  ;;  %v1082_v12 = vpop.permute.xlu0 %1081  ;;  %v1489_v14 = vld [vmem:[#allocation7 + $0x128] sm:$0xff] }
 0x2e8   :  { %v1106_v42 = vpop.permute.xlu1 %1105  ;;  %1170 = vxpose.xlu0.b32.cont [7/12] (short) (narrow) %v1152_v17, 120  ;;  %1202 = vxpose.xlu1.b32.cont [7/12] (short) (narrow) %v1153_v55, 104  ;;  %v1405_v17 = vld [vmem:[#allocation7 + $0xe0] sm:$0xff] }
 0x2e9   :  { %v1123_v6 = vsel %vm1115_vm7, %v1082_v12, %v1106_v42  ;;  %v1135_v19 = vsel %vm1115_vm7, %v1106_v42, %v1082_v12  ;;  %v1488_v55 = vld [vmem:[#allocation7 + $0x120] sm:$0xff]  ;;  %v1404_v12 = vld [vmem:[#allocation7 + $0xd8] sm:$0xff] }
 0x2ea   :  { %v1154_v44 = vmax.f32 %v4049_v35, %v1135_v19  ;;  %v1155_v39 = vmax.f32 %v4059_v4, %v1123_v6  ;;  %v1084_v43 = vpop.permute.xlu0 %1083  ;;  %v1403_v19 = vld [vmem:[#allocation7 + $0xd0] sm:$0xff] }
 0x2ec   :  { %v1108_v27 = vpop.permute.xlu1 %1107  ;;  %1171 = vxpose.xlu0.b32.cont [8/12] (short) (narrow) %v1154_v44, 120  ;;  %1203 = vxpose.xlu1.b32.cont [8/12] (short) (narrow) %v1155_v39, 104  ;;  %v1673_v44 = vld [vmem:[#allocation7 + $0x238] sm:$0xff]  ;;  %v1402_v39 = vld [vmem:[#allocation7 + $0xc8] sm:$0xff] }
 0x2ed   :  { %v1124_v15 = vsel %vm1115_vm7, %v1084_v43, %v1108_v27  ;;  %v1136_v26 = vsel %vm1115_vm7, %v1108_v27, %v1084_v43  ;;  %v1672_v43 = vld [vmem:[#allocation7 + $0x230] sm:$0xff] }
 0x2ee   :  { %v1156_v1 = vmax.f32 %v4069_v21, %v1136_v26  ;;  %v1157_v60 = vmax.f32 %v4081_v2, %v1124_v15  ;;  %v1086_v20 = vpop.permute.xlu0 %1085  ;;  %v1401_v26 = vld [vmem:[#allocation7 + $0xc0] sm:$0xff] }
 0x2f0   :  { %v1110_v9 = vpop.permute.xlu1 %1109  ;;  %1172 = vxpose.xlu0.b32.cont [9/12] (short) (narrow) %v1156_v1, 120  ;;  %1204 = vxpose.xlu1.b32.cont [9/12] (short) (narrow) %v1157_v60, 104  ;;  %v1671_v1 = vld [vmem:[#allocation7 + $0x228] sm:$0xff]  ;;  %v1586_v60 = vld [vmem:[#allocation7 + $0x1d8] sm:$0xff] }
 0x2f1   :  { %v1125_v35 = vsel %vm1115_vm7, %v1086_v20, %v1110_v9  ;;  %v1137_v4 = vsel %vm1115_vm7, %v1110_v9, %v1086_v20  ;;  %v1670_v20 = vld [vmem:[#allocation7 + $0x220] sm:$0xff] }
 0x2f2   :  { %v1158_v46 = vmax.f32 %v4088_v38, %v1137_v4  ;;  %v1159_v50 = vmax.f32 %v4098_v62, %v1125_v35  ;;  %v1088_v36 = vpop.permute.xlu0 %1087  ;;  %v1585_v4 = vld [vmem:[#allocation7 + $0x1d0] sm:$0xff] }
 0x2f4   :  { %v1112_v22 = vpop.permute.xlu1 %1111  ;;  %1173 = vxpose.xlu0.b32.cont [10/12] (short) (narrow) %v1158_v46, 120  ;;  %1205 = vxpose.xlu1.b32.cont [10/12] (short) (narrow) %v1159_v50, 104  ;;  %v1669_v46 = vld [vmem:[#allocation7 + $0x218] sm:$0xff]  ;;  %v1584_v50 = vld [vmem:[#allocation7 + $0x1c8] sm:$0xff] }
 0x2f5   :  { %v1126_v21 = vsel %vm1115_vm7, %v1088_v36, %v1112_v22  ;;  %v1138_v2 = vsel %vm1115_vm7, %v1112_v22, %v1088_v36  ;;  %v1668_v36 = vld [vmem:[#allocation7 + $0x210] sm:$0xff] }
 0x2f6   :  { %v1160_v47 = vmax.f32 %v4104_v48, %v1138_v2  ;;  %v1161_v32 = vmax.f32 %v4116_v34, %v1126_v21  ;;  %v1090_v56 = vpop.permute.xlu0 %1089  ;;  %v1499_v48 = vld [vmem:[#allocation7 + $0x178] sm:$0xff]  ;;  %v1583_v2 = vld [vmem:[#allocation7 + $0x1c0] sm:$0xff] }
 0x2f8   :  { %v1114_v16 = vpop.permute.xlu1 %1113  ;;  %1174 = vxpose.xlu0.b32.cont [11/12] (short) (narrow) %v1160_v47, 120  ;;  %1206 = vxpose.xlu1.b32.cont [11/12] (short) (narrow) %v1161_v32, 104  ;;  %v1667_v47 = vld [vmem:[#allocation7 + $0x208] sm:$0xff]  ;;  %v1582_v32 = vld [vmem:[#allocation7 + $0x1b8] sm:$0xff] }
 0x2f9   :  { %v1127_v38 = vsel %vm1115_vm7, %v1090_v56, %v1114_v16  ;;  %v1139_v62 = vsel %vm1115_vm7, %v1114_v16, %v1090_v56  ;;  %v1666_v56 = vld [vmem:[#allocation7 + $0x200] sm:$0xff] }
 0x2fa   :  { %v1162_v40 = vmax.f32 %v4123_v8, %v1139_v62  ;;  %v1163_v63 = vmax.f32 %v4134_v53, %v1127_v38  ;;  %v1581_v62 = vld [vmem:[#allocation7 + $0x1b0] sm:$0xff] }
 0x2fc   :  { %1175 = vxpose.xlu0.b32.end [12/12] (short) (narrow) %v1162_v40, 120  ;;  %1207 = vxpose.xlu1.b32.end [12/12] (short) (narrow) %v1163_v63, 104  ;;  %v1665_v40 = vld [vmem:[#allocation7 + $0x1f8] sm:$0xff]  ;;  %v1580_v63 = vld [vmem:[#allocation7 + $0x1a8] sm:$0xff] }
 0x34c   :  { %v1180_v29 = vpop.trf.xlu0  ;;  %v4233_v34 = vpop.trf.xlu1 }
 0x34d   :  { %2833 = vmatmul.mubr.msk.f32.vlgmr.msra.gmra.mxu1 %vm1253_vm8, %v1180_v29 }
 0x34e   :  { %2863 = vmatpush3.msra.mxu1 %v1499_v48  ;;  %2886 = vmatprep.mubr.msk.f32.mxu1 %vm3308_vm6, %v3307_v10  ;;  %v1664_v48 = vld [vmem:[#allocation7 + $0x1f0] sm:$0xff] }
 0x34f   :  { %2864 = vmatprep.subr.mxu1 %v3307_v10 }
 0x350   :  { %v1181_v8 = vpop.trf.xlu0  ;;  %2865 = vmatpush3.msra.mxu1 %v1498_v13  ;;  %v1213_v53 = vpop.trf.xlu1 }
 0x351   :  { %2866 = vmatprep.subr.mxu1 %v3307_v10  ;;  %v1578_v8 = vld [vmem:[#allocation7 + $0x198] sm:$0xff]  ;;  %v1663_v53 = vld [vmem:[#allocation7 + $0x1e8] sm:$0xff] }
 0x352   :  { %2867 = vmatpush3.msra.mxu1 %v1497_v37  ;;  %v1579_v37 = vld [vmem:[#allocation7 + $0x1a0] sm:$0xff] }
 0x353   :  { %2868 = vmatprep.subr.mxu1 %v3307_v10 }
 0x354   :  { %v1182_v25 = vpop.trf.xlu0  ;;  %2869 = vmatpush3.msra.mxu1 %v1496_v18  ;;  %v4241_v0 = vpop.trf.xlu1 }
 0x355   :  { %2806 = vmatmul.mubr.msk.f32.vlgmr.msra.gmra.mxu0 %vm1253_vm8, %v1182_v25  ;;  %2870 = vmatprep.subr.mxu1 %v3307_v10  ;;  %v1576_v25 = vld [vmem:[#allocation7 + $0x188] sm:$0xff] }
 0x356   :  { %2836 = vmatpush3.msra.mxu0 %v1412_v33  ;;  %2871 = vmatpush3.msra.mxu1 %v1495_v11  ;;  %v1577_v33 = vld [vmem:[#allocation7 + $0x190] sm:$0xff]  ;;  %v1662_v11 = vld [vmem:[#allocation7 + $0x1e0] sm:$0xff] }
 0x357   :  { %2837 = vmatprep.subr.mxu0 %v3307_v10  ;;  %2872 = vmatprep.subr.mxu1 %v3307_v10 }
 0x358   :  { %2838 = vmatpush3.msra.mxu0 %v1411_v28  ;;  %2873 = vmatpush3.msra.mxu1 %v1494_v52  ;;  %v1183_v30 = vpop.trf.xlu0  ;;  %v1215_v59 = vpop.trf.xlu1  ;;  %v1575_v52 = vld [vmem:[#allocation7 + $0x180] sm:$0xff] }
 0x359   :  { %2839 = vmatprep.subr.mxu0 %v3307_v10  ;;  %2874 = vmatprep.subr.mxu1 %v3307_v10  ;;  %v1846_v30 = vld [vmem:[#allocation7 + $0x2f0] sm:$0xff] }
 0x35a   :  { %2840 = vmatpush3.msra.mxu0 %v1410_v57  ;;  %2875 = vmatpush3.msra.mxu1 %v1493_v49  ;;  %v1847_v57 = vld [vmem:[#allocation7 + $0x2f8] sm:$0xff]  ;;  %v1759_v59 = vld [vmem:[#allocation7 + $0x290] sm:$0xff] }
 0x35b   :  { %2841 = vmatprep.subr.mxu0 %v3307_v10  ;;  %2876 = vmatprep.subr.mxu1 %v3307_v10  ;;  %v1760_v49 = vld [vmem:[#allocation7 + $0x298] sm:$0xff] }
 0x35c   :  { %2842 = vmatpush3.msra.mxu0 %v1409_v45  ;;  %2877 = vmatpush3.msra.mxu1 %v1492_v58  ;;  %v1184_v7 = vpop.trf.xlu0  ;;  %v4251_v54 = vpop.trf.xlu1  ;;  %v1845_v45 = vld [vmem:[#allocation7 + $0x2e8] sm:$0xff] }
 0x35d   :  { %2843 = vmatprep.subr.mxu0 %v3307_v10  ;;  %2878 = vmatprep.subr.mxu1 %v3307_v10  ;;  %v1758_v58 = vld [vmem:[#allocation7 + $0x288] sm:$0xff] }
 0x35e   :  { %2844 = vmatpush3.msra.mxu0 %v1408_v5  ;;  %2879 = vmatpush3.msra.mxu1 %v1491_v61  ;;  %v1844_v5 = vld [vmem:[#allocation7 + $0x2e0] sm:$0xff] }
 0x35f   :  { %2845 = vmatprep.subr.mxu0 %v3307_v10  ;;  %2880 = vmatprep.subr.mxu1 %v3307_v10  ;;  %v1757_v61 = vld [vmem:[#allocation7 + $0x280] sm:$0xff] }
 0x360   :  { %2846 = vmatpush3.msra.mxu0 %v1407_v51  ;;  %2881 = vmatpush3.msra.mxu1 %v1490_v24  ;;  %v1185_v23 = vpop.trf.xlu0  ;;  %v1217_v3 = vpop.trf.xlu1  ;;  %v1756_v51 = vld [vmem:[#allocation7 + $0x278] sm:$0xff]  ;;  %v1842_v24 = vld [vmem:[#allocation7 + $0x2d0] sm:$0xff] }
 0x361   :  { %2847 = vmatprep.subr.mxu0 %v3307_v10  ;;  %2882 = vmatprep.subr.mxu1 %v3307_v10  ;;  %v1841_v23 = vld [vmem:[#allocation7 + $0x2c8] sm:$0xff]  ;;  %v1840_v3 = vld [vmem:[#allocation7 + $0x2c0] sm:$0xff] }
 0x362   :  { %2848 = vmatpush3.msra.mxu0 %v1406_v41  ;;  %2859 = vmatprep.mubr.msk.f32.mxu0 %vm3308_vm6, %v3307_v10  ;;  %v1755_v41 = vld [vmem:[#allocation7 + $0x270] sm:$0xff] }
 0x363   :  { %2849 = vmatprep.subr.mxu0 %v3307_v10  ;;  %2883 = vmatpush3.msra.mxu1 %v1489_v14  ;;  %v1754_v14 = vld [vmem:[#allocation7 + $0x268] sm:$0xff] }
 0x364   :  { %2850 = vmatpush3.msra.mxu0 %v1405_v17  ;;  %2884 = vmatprep.subr.mxu1 %v3307_v10  ;;  %v1186_v42 = vpop.trf.xlu0  ;;  %v4263_v6 = vpop.trf.xlu1  ;;  %v1753_v17 = vld [vmem:[#allocation7 + $0x260] sm:$0xff] }
 0x365   :  { %2851 = vmatprep.subr.mxu0 %v3307_v10  ;;  %2885 = vmatpush3.msra.mxu1 %v1488_v55  ;;  %v1839_v55 = vld [vmem:[#allocation7 + $0x2b8] sm:$0xff] }
 0x366   :  { %2852 = vmatpush3.msra.mxu0 %v1404_v12  ;;  %2887 = vmatmul.mubr.msk.f32.vlgmr.msra.gmra.mxu1 %vm1253_vm8, %v1186_v42  ;;  %v1752_v12 = vld [vmem:[#allocation7 + $0x258] sm:$0xff]  ;;  %v1838_v42 = vld [vmem:[#allocation7 + $0x2b0] sm:$0xff] }
 0x367   :  { %2853 = vmatprep.subr.mxu0 %v3307_v10  ;;  %2916 = vmatprep.subr.mxu1 %v3307_v10 }
 0x368   :  { %2854 = vmatpush3.msra.mxu0 %v1403_v19  ;;  %2917 = vmatpush3.msra.mxu1 %v1673_v44  ;;  %v1187_v27 = vpop.trf.xlu0  ;;  %v1219_v15 = vpop.trf.xlu1  ;;  %v1751_v19 = vld [vmem:[#allocation7 + $0x250] sm:$0xff]  ;;  %v1750_v44 = vld [vmem:[#allocation7 + $0x248] sm:$0xff] }
 0x369   :  { %2855 = vmatprep.subr.mxu0 %v3307_v10  ;;  %2918 = vmatprep.subr.mxu1 %v3307_v10  ;;  %v1836_v27 = vld [vmem:[#allocation7 + $0x2a0] sm:$0xff]  ;;  %v1934_v15 = vld [vmem:[#allocation7 + $0x358] sm:$0xff] }
 0x36a   :  { %2856 = vmatpush3.msra.mxu0 %v1402_v39  ;;  %2919 = vmatpush3.msra.mxu1 %v1672_v43  ;;  %v1837_v39 = vld [vmem:[#allocation7 + $0x2a8] sm:$0xff]  ;;  %v1749_v43 = vld [vmem:[#allocation7 + $0x240] sm:$0xff] }
 0x36b   :  { %2857 = vmatprep.subr.mxu0 %v3307_v10  ;;  %2920 = vmatprep.subr.mxu1 %v3307_v10 }
 0x36c   :  { %2858 = vmatpush3.msra.mxu0 %v1401_v26  ;;  %2921 = vmatpush3.msra.mxu1 %v1671_v1  ;;  %v4273_v9 = vpop.trf.xlu0  ;;  %v4275_v35 = vpop.trf.xlu1  ;;  %v1933_v1 = vld [vmem:[#allocation7 + $0x350] sm:$0xff] }
 0x36d   :  { %2860 = vmatmul.mubr.msk.f32.vlgmr.msra.gmra.mxu0 %vm1253_vm8, %v1184_v7  ;;  %2889 = vmatprep.subr.mxu0 %v3307_v10  ;;  %v1843_v7 = vld [vmem:[#allocation7 + $0x2d8] sm:$0xff] }
 0x36e   :  { %2890 = vmatpush3.msra.mxu0 %v1586_v60  ;;  %2922 = vmatprep.subr.mxu1 %v3307_v10  ;;  %v2021_v60 = vld [vmem:[#allocation7 + $0x3b8] sm:$0xff] }
 0x36f   :  { %2891 = vmatprep.subr.mxu0 %v3307_v10  ;;  %2923 = vmatpush3.msra.mxu1 %v1670_v20  ;;  %v1932_v20 = vld [vmem:[#allocation7 + $0x348] sm:$0xff] }
 0x370   :  { %2892 = vmatpush3.msra.mxu0 %v1585_v4  ;;  %2924 = vmatprep.subr.mxu1 %v3307_v10  ;;  %v1189_v22 = vpop.trf.xlu0  ;;  %v1221_v21 = vpop.trf.xlu1  ;;  %v1931_v4 = vld [vmem:[#allocation7 + $0x340] sm:$0xff] }
 0x371   :  { %2893 = vmatprep.subr.mxu0 %v3307_v10  ;;  %2925 = vmatpush3.msra.mxu1 %v1669_v46  ;;  %v2019_v46 = vld [vmem:[#allocation7 + $0x3a8] sm:$0xff]  ;;  %v1929_v22 = vld [vmem:[#allocation7 + $0x330] sm:$0xff]  ;;  %v2017_v21 = vld [vmem:[#allocation7 + $0x398] sm:$0xff] }
 0x372   :  { %2894 = vmatpush3.msra.mxu0 %v1584_v50  ;;  %2926 = vmatprep.subr.mxu1 %v3307_v10  ;;  %v1930_v50 = vld [vmem:[#allocation7 + $0x338] sm:$0xff] }
 0x373   :  { %2895 = vmatprep.subr.mxu0 %v3307_v10  ;;  %2927 = vmatpush3.msra.mxu1 %v1668_v36  ;;  %v2018_v36 = vld [vmem:[#allocation7 + $0x3a0] sm:$0xff] }
 0x374   :  { %2896 = vmatpush3.msra.mxu0 %v1583_v2  ;;  %2928 = vmatprep.subr.mxu1 %v3307_v10  ;;  %v1190_v16 = vpop.trf.xlu0  ;;  %v4286_v38 = vpop.trf.xlu1  ;;  %v1928_v2 = vld [vmem:[#allocation7 + $0x328] sm:$0xff] }
 0x375   :  { %2897 = vmatprep.subr.mxu0 %v3307_v10  ;;  %2929 = vmatpush3.msra.mxu1 %v1667_v47  ;;  %v2016_v47 = vld [vmem:[#allocation7 + $0x390] sm:$0xff] }
 0x376   :  { %2898 = vmatpush3.msra.mxu0 %v1582_v32  ;;  %2930 = vmatprep.subr.mxu1 %v3307_v10  ;;  %v1927_v32 = vld [vmem:[#allocation7 + $0x320] sm:$0xff] }
 0x377   :  { %2899 = vmatprep.subr.mxu0 %v3307_v10  ;;  %2931 = vmatpush3.msra.mxu1 %v1666_v56  ;;  %v2015_v56 = vld [vmem:[#allocation7 + $0x388] sm:$0xff] }
 0x378   :  { %2900 = vmatpush3.msra.mxu0 %v1581_v62  ;;  %2932 = vmatprep.subr.mxu1 %v3307_v10  ;;  %v1191_v29 = vpop.trf.xlu0  ;;  %v1223_v13 = vpop.trf.xlu1  ;;  %v2014_v62 = vld [vmem:[#allocation7 + $0x380] sm:$0xff] }
 0x379   :  { %2901 = vmatprep.subr.mxu0 %v3307_v10  ;;  %2933 = vmatpush3.msra.mxu1 %v1665_v40  ;;  %v1925_v40 = vld [vmem:[#allocation7 + $0x310] sm:$0xff]  ;;  %v1923_v13 = vld [vmem:[#allocation7 + $0x300] sm:$0xff] }
 0x37a   :  { %2902 = vmatpush3.msra.mxu0 %v1580_v63  ;;  %2934 = vmatprep.subr.mxu1 %v3307_v10  ;;  %v2013_v63 = vld [vmem:[#allocation7 + $0x378] sm:$0xff]  ;;  %v2012_v29 = vld [vmem:[#allocation7 + $0x370] sm:$0xff] }
 0x37b   :  { %2903 = vmatprep.subr.mxu0 %v3307_v10  ;;  %2935 = vmatpush3.msra.mxu1 %v1664_v48  ;;  %v1924_v48 = vld [vmem:[#allocation7 + $0x308] sm:$0xff] }
 0x37c   :  { %2904 = vmatpush3.msra.mxu0 %v1579_v37  ;;  %2936 = vmatprep.subr.mxu1 %v3307_v10  ;;  %v4296_v18 = vpop.trf.xlu0  ;;  %v2011_v37 = vld [vmem:[#allocation7 + $0x368] sm:$0xff] }
 0x37d   :  { %2905 = vmatprep.subr.mxu0 %v3307_v10  ;;  %2913 = vmatprep.mubr.msk.f32.mxu0 %vm3308_vm6, %v3307_v10 }
 0x37e   :  { %2906 = vmatpush3.msra.mxu0 %v1578_v8  ;;  %2937 = vmatpush3.msra.mxu1 %v1663_v53  ;;  %v2010_v8 = vld [vmem:[#allocation7 + $0x360] sm:$0xff]  ;;  %v2108_v53 = vld [vmem:[#allocation7 + $0x418] sm:$0xff] }
 0x37f   :  { %2907 = vmatprep.subr.mxu0 %v3307_v10  ;;  %2938 = vmatprep.subr.mxu1 %v3307_v10 }
 0x380   :  { %2908 = vmatpush3.msra.mxu0 %v1577_v33  ;;  %2939 = vmatpush3.msra.mxu1 %v1662_v11  ;;  %v1193_v28 = vpop.trf.xlu0  ;;  %v2195_v33 = vld [vmem:[#allocation7 + $0x478] sm:$0xff]  ;;  %v2106_v11 = vld [vmem:[#allocation7 + $0x408] sm:$0xff] }
 0x381   :  { %2909 = vmatprep.subr.mxu0 %v3307_v10  ;;  %2940 = vmatprep.mubr.msk.f32.mxu1 %vm3308_vm6, %v3307_v10  ;;  %v2193_v28 = vld [vmem:[#allocation7 + $0x468] sm:$0xff] }
 0x382   :  { %2910 = vmatpush3.msra.mxu0 %v1576_v25  ;;  %2941 = vmatmul.mubr.msk.f32.vlgmr.msra.gmra.mxu1 %vm1253_vm8, %v1190_v16  ;;  %v1926_v16 = vld [vmem:[#allocation7 + $0x318] sm:$0xff]  ;;  %v2105_v25 = vld [vmem:[#allocation7 + $0x400] sm:$0xff] }
 0x383   :  { %2911 = vmatprep.subr.mxu0 %v3307_v10  ;;  %2970 = vmatprep.subr.mxu1 %v3307_v10 }
 0x384   :  { %2912 = vmatpush3.msra.mxu0 %v1575_v52  ;;  %2971 = vmatpush3.msra.mxu1 %v1847_v57  ;;  %v1194_v26 = vpop.trf.xlu0  ;;  %v2104_v52 = vld [vmem:[#allocation7 + $0x3f8] sm:$0xff]  ;;  %v2103_v57 = vld [vmem:[#allocation7 + $0x3f0] sm:$0xff] }
 0x385   :  { %2914 = vmatmul.mubr.msk.f32.vlgmr.msra.gmra.mxu0 %vm1253_vm8, %v4273_v9  ;;  %2943 = vmatprep.subr.mxu0 %v3307_v10  ;;  %v2020_v9 = vld [vmem:[#allocation7 + $0x3b0] sm:$0xff] }
 0x386   :  { %2944 = vmatpush3.msra.mxu0 %v1760_v49  ;;  %2972 = vmatprep.subr.mxu1 %v3307_v10  ;;  %v2191_v49 = vld [vmem:[#allocation7 + $0x458] sm:$0xff] }
 0x387   :  { %2945 = vmatprep.subr.mxu0 %v3307_v10  ;;  %2973 = vmatpush3.msra.mxu1 %v1846_v30  ;;  %v2102_v30 = vld [vmem:[#allocation7 + $0x3e8] sm:$0xff] }
 0x388   :  { %2946 = vmatpush3.msra.mxu0 %v1759_v59  ;;  %2974 = vmatprep.subr.mxu1 %v3307_v10  ;;  %v2190_v59 = vld [vmem:[#allocation7 + $0x450] sm:$0xff] }
 0x389   :  { %2947 = vmatprep.subr.mxu0 %v3307_v10  ;;  %2975 = vmatpush3.msra.mxu1 %v1845_v45  ;;  %v2101_v45 = vld [vmem:[#allocation7 + $0x3e0] sm:$0xff] }
 0x38a   :  { %2948 = vmatpush3.msra.mxu0 %v1758_v58  ;;  %2976 = vmatprep.subr.mxu1 %v3307_v10  ;;  %v2189_v58 = vld [vmem:[#allocation7 + $0x448] sm:$0xff] }
 0x38b   :  { %2949 = vmatprep.subr.mxu0 %v3307_v10  ;;  %2977 = vmatpush3.msra.mxu1 %v1844_v5  ;;  %v2100_v5 = vld [vmem:[#allocation7 + $0x3d8] sm:$0xff] }
 0x38c   :  { %2950 = vmatpush3.msra.mxu0 %v1757_v61  ;;  %2978 = vmatprep.subr.mxu1 %v3307_v10  ;;  %v2188_v61 = vld [vmem:[#allocation7 + $0x440] sm:$0xff] }
 0x38d   :  { %2951 = vmatprep.subr.mxu0 %v3307_v10  ;;  %2979 = vmatpush3.msra.mxu1 %v1843_v7  ;;  %v2099_v7 = vld [vmem:[#allocation7 + $0x3d0] sm:$0xff] }
 0x38e   :  { %2952 = vmatpush3.msra.mxu0 %v1756_v51  ;;  %2980 = vmatprep.subr.mxu1 %v3307_v10  ;;  %v2187_v51 = vld [vmem:[#allocation7 + $0x438] sm:$0xff] }
 0x38f   :  { %2953 = vmatprep.subr.mxu0 %v3307_v10  ;;  %2981 = vmatpush3.msra.mxu1 %v1842_v24  ;;  %v2098_v24 = vld [vmem:[#allocation7 + $0x3c8] sm:$0xff] }
 0x390   :  { %2954 = vmatpush3.msra.mxu0 %v1755_v41  ;;  %2982 = vmatprep.subr.mxu1 %v3307_v10  ;;  %v2186_v41 = vld [vmem:[#allocation7 + $0x430] sm:$0xff] }
 0x391   :  { %2955 = vmatprep.subr.mxu0 %v3307_v10  ;;  %2983 = vmatpush3.msra.mxu1 %v1841_v23  ;;  %v2097_v23 = vld [vmem:[#allocation7 + $0x3c0] sm:$0xff] }
 0x392   :  { %2956 = vmatpush3.msra.mxu0 %v1754_v14  ;;  %2984 = vmatprep.subr.mxu1 %v3307_v10  ;;  %v2185_v14 = vld [vmem:[#allocation7 + $0x428] sm:$0xff] }
 0x393   :  { %2957 = vmatprep.subr.mxu0 %v3307_v10  ;;  %2985 = vmatpush3.msra.mxu1 %v1840_v3  ;;  %v2184_v3 = vld [vmem:[#allocation7 + $0x420] sm:$0xff] }
 0x394   :  { %2958 = vmatpush3.msra.mxu0 %v1753_v17  ;;  %2986 = vmatprep.subr.mxu1 %v3307_v10  ;;  %v2282_v17 = vld [vmem:[#allocation7 + $0x4d8] sm:$0xff] }
 0x395   :  { %2959 = vmatprep.subr.mxu0 %v3307_v10  ;;  %2987 = vmatpush3.msra.mxu1 %v1839_v55  ;;  %v2281_v55 = vld [vmem:[#allocation7 + $0x4d0] sm:$0xff] }
 0x396   :  { %2960 = vmatpush3.msra.mxu0 %v1752_v12  ;;  %2988 = vmatprep.subr.mxu1 %v3307_v10  ;;  %v2369_v12 = vld [vmem:[#allocation7 + $0x538] sm:$0xff] }
 0x397   :  { %2961 = vmatprep.subr.mxu0 %v3307_v10  ;;  %2989 = vmatpush3.msra.mxu1 %v1838_v42  ;;  %v2280_v42 = vld [vmem:[#allocation7 + $0x4c8] sm:$0xff] }
 0x398   :  { %2962 = vmatpush3.msra.mxu0 %v1751_v19  ;;  %2990 = vmatprep.subr.mxu1 %v3307_v10  ;;  %v2279_v19 = vld [vmem:[#allocation7 + $0x4c0] sm:$0xff] }
 0x399   :  { %2963 = vmatprep.subr.mxu0 %v3307_v10  ;;  %2967 = vmatprep.mubr.msk.f32.mxu0 %vm3308_vm6, %v3307_v10 }
 0x39a   :  { %2964 = vmatpush3.msra.mxu0 %v1750_v44  ;;  %2991 = vmatpush3.msra.mxu1 %v1837_v39  ;;  %v2367_v44 = vld [vmem:[#allocation7 + $0x528] sm:$0xff]  ;;  %v2278_v39 = vld [vmem:[#allocation7 + $0x4b8] sm:$0xff] }
 0x39b   :  { %2965 = vmatprep.subr.mxu0 %v3307_v10  ;;  %2992 = vmatprep.subr.mxu1 %v3307_v10 }
 0x39c   :  { %2966 = vmatpush3.msra.mxu0 %v1749_v43  ;;  %2993 = vmatpush3.msra.mxu1 %v1836_v27  ;;  %v2277_v43 = vld [vmem:[#allocation7 + $0x4b0] sm:$0xff]  ;;  %v2365_v27 = vld [vmem:[#allocation7 + $0x518] sm:$0xff] }
 0x39d   :  { %2968 = vmatmul.mubr.msk.f32.vlgmr.msra.gmra.mxu0 %vm1253_vm8, %v4296_v18  ;;  %2997 = vmatprep.subr.mxu0 %v3307_v10  ;;  %v2107_v18 = vld [vmem:[#allocation7 + $0x410] sm:$0xff] }
 0x39e   :  { %2994 = vmatprep.mubr.msk.f32.mxu1 %vm3308_vm6, %v3307_v10  ;;  %2998 = vmatpush3.msra.mxu0 %v1934_v15  ;;  %v2276_v15 = vld [vmem:[#allocation7 + $0x4a8] sm:$0xff] }
 0x39f   :  { %2995 = vmatmul.mubr.msk.f32.vlgmr.msra.gmra.mxu1 %vm1253_vm8, %v1194_v26  ;;  %2999 = vmatprep.subr.mxu0 %v3307_v10  ;;  %v2364_v26 = vld [vmem:[#allocation7 + $0x510] sm:$0xff] }
 0x3a0   :  { %3024 = vmatprep.subr.mxu1 %v3307_v10  ;;  %3000 = vmatpush3.msra.mxu0 %v1933_v1  ;;  %v2275_v1 = vld [vmem:[#allocation7 + $0x4a0] sm:$0xff] }
 0x3a1   :  { %3025 = vmatpush3.msra.mxu1 %v2021_v60  ;;  %3001 = vmatprep.subr.mxu0 %v3307_v10  ;;  %v2363_v60 = vld [vmem:[#allocation7 + $0x508] sm:$0xff] }
 0x3a2   :  { %3026 = vmatprep.subr.mxu1 %v3307_v10  ;;  %3002 = vmatpush3.msra.mxu0 %v1932_v20  ;;  %v2274_v20 = vld [vmem:[#allocation7 + $0x498] sm:$0xff] }
 0x3a3   :  { %3027 = vmatpush3.msra.mxu1 %v2020_v9  ;;  %3003 = vmatprep.subr.mxu0 %v3307_v10  ;;  %v2362_v9 = vld [vmem:[#allocation7 + $0x500] sm:$0xff] }
 0x3a4   :  { %3028 = vmatprep.subr.mxu1 %v3307_v10  ;;  %3004 = vmatpush3.msra.mxu0 %v1931_v4  ;;  %v2273_v4 = vld [vmem:[#allocation7 + $0x490] sm:$0xff] }
 0x3a5   :  { %3029 = vmatpush3.msra.mxu1 %v2019_v46  ;;  %3005 = vmatprep.subr.mxu0 %v3307_v10  ;;  %v2361_v46 = vld [vmem:[#allocation7 + $0x4f8] sm:$0xff] }
 0x3a6   :  { %3030 = vmatprep.subr.mxu1 %v3307_v10  ;;  %3006 = vmatpush3.msra.mxu0 %v1930_v50  ;;  %v2272_v50 = vld [vmem:[#allocation7 + $0x488] sm:$0xff] }
 0x3a7   :  { %3031 = vmatpush3.msra.mxu1 %v2018_v36  ;;  %3007 = vmatprep.subr.mxu0 %v3307_v10  ;;  %v2360_v36 = vld [vmem:[#allocation7 + $0x4f0] sm:$0xff] }
 0x3a8   :  { %3032 = vmatprep.subr.mxu1 %v3307_v10  ;;  %3008 = vmatpush3.msra.mxu0 %v1929_v22  ;;  %v2271_v22 = vld [vmem:[#allocation7 + $0x480] sm:$0xff] }
 0x3a9   :  { %3033 = vmatpush3.msra.mxu1 %v2017_v21  ;;  %3009 = vmatprep.subr.mxu0 %v3307_v10  ;;  %v2359_v21 = vld [vmem:[#allocation7 + $0x4e8] sm:$0xff] }
 0x3aa   :  { %3034 = vmatprep.subr.mxu1 %v3307_v10  ;;  %3010 = vmatpush3.msra.mxu0 %v1928_v2  ;;  %v2358_v2 = vld [vmem:[#allocation7 + $0x4e0] sm:$0xff] }
 0x3ab   :  { %3035 = vmatpush3.msra.mxu1 %v2016_v47  ;;  %3011 = vmatprep.subr.mxu0 %v3307_v10  ;;  %v2456_v47 = vld [vmem:[#allocation7 + $0x598] sm:$0xff] }
 0x3ac   :  { %3036 = vmatprep.subr.mxu1 %v3307_v10  ;;  %3012 = vmatpush3.msra.mxu0 %v1927_v32  ;;  %v2455_v32 = vld [vmem:[#allocation7 + $0x590] sm:$0xff] }
 0x3ad   :  { %3037 = vmatpush3.msra.mxu1 %v2015_v56  ;;  %3013 = vmatprep.subr.mxu0 %v3307_v10  ;;  %v2454_v56 = vld [vmem:[#allocation7 + $0x588] sm:$0xff] }
 0x3ae   :  { %3038 = vmatprep.subr.mxu1 %v3307_v10  ;;  %3014 = vmatpush3.msra.mxu0 %v1926_v16  ;;  %v2452_v16 = vld [vmem:[#allocation7 + $0x578] sm:$0xff] }
 0x3af   :  { %3039 = vmatpush3.msra.mxu1 %v2014_v62  ;;  %3015 = vmatprep.subr.mxu0 %v3307_v10  ;;  %v2451_v62 = vld [vmem:[#allocation7 + $0x570] sm:$0xff] }
 0x3b0   :  { %3040 = vmatprep.subr.mxu1 %v3307_v10  ;;  %3016 = vmatpush3.msra.mxu0 %v1925_v40  ;;  %v2449_v40 = vld [vmem:[#allocation7 + $0x560] sm:$0xff] }
 0x3b1   :  { %3041 = vmatpush3.msra.mxu1 %v2013_v63  ;;  %3017 = vmatprep.subr.mxu0 %v3307_v10  ;;  %v2448_v63 = vld [vmem:[#allocation7 + $0x558] sm:$0xff] }
 0x3b2   :  { %3042 = vmatprep.subr.mxu1 %v3307_v10  ;;  %3018 = vmatpush3.msra.mxu0 %v1924_v48  ;;  %v2447_v48 = vld [vmem:[#allocation7 + $0x550] sm:$0xff] }
 0x3b3   :  { %3043 = vmatpush3.msra.mxu1 %v2012_v29  ;;  %3019 = vmatprep.subr.mxu0 %v3307_v10  ;;  %v2446_v29 = vld [vmem:[#allocation7 + $0x548] sm:$0xff] }
 0x3b4   :  { %3044 = vmatprep.subr.mxu1 %v3307_v10  ;;  %3020 = vmatpush3.msra.mxu0 %v1923_v13  ;;  %v2445_v13 = vld [vmem:[#allocation7 + $0x540] sm:$0xff] }
 0x3b5   :  { %3021 = vmatprep.mubr.msk.f32.mxu0 %vm3308_vm6, %v3307_v10  ;;  %3045 = vmatpush3.msra.mxu1 %v2011_v37  ;;  %v1224_v37 = vpop.trf.xlu1 }
 0x3b6   :  { %3022 = vmatmul.mubr.msk.f32.vlgmr.msra.gmra.mxu0 %vm1253_vm8, %v4233_v34  ;;  %3046 = vmatprep.subr.mxu1 %v3307_v10  ;;  %v2194_v34 = vld [vmem:[#allocation7 + $0x470] sm:$0xff] }
 0x3b7   :  { %3051 = vmatprep.subr.mxu0 %v3307_v10  ;;  %3047 = vmatpush3.msra.mxu1 %v2010_v8 }
 0x3b8   :  { %3048 = vmatprep.mubr.msk.f32.mxu1 %vm3308_vm6, %v3307_v10  ;;  %3052 = vmatpush3.msra.mxu0 %v2108_v53 }
 0x3b9   :  { %3049 = vmatmul.mubr.msk.f32.vlgmr.msra.gmra.mxu1 %vm1253_vm8, %v4241_v0  ;;  %3053 = vmatprep.subr.mxu0 %v3307_v10  ;;  %v2192_v0 = vld [vmem:[#allocation7 + $0x460] sm:$0xff] }
 0x3ba   :  { %3078 = vmatprep.subr.mxu1 %v3307_v10  ;;  %3054 = vmatpush3.msra.mxu0 %v2107_v18 }
 0x3bb   :  { %3079 = vmatpush3.msra.mxu1 %v2195_v33  ;;  %3055 = vmatprep.subr.mxu0 %v3307_v10 }
 0x3bc   :  { %3080 = vmatprep.subr.mxu1 %v3307_v10  ;;  %3056 = vmatpush3.msra.mxu0 %v2106_v11 }
 0x3bd   :  { %3081 = vmatpush3.msra.mxu1 %v2194_v34  ;;  %3057 = vmatprep.subr.mxu0 %v3307_v10 }
 0x3be   :  { %3082 = vmatprep.subr.mxu1 %v3307_v10  ;;  %3058 = vmatpush3.msra.mxu0 %v2105_v25 }
 0x3bf   :  { %3083 = vmatpush3.msra.mxu1 %v2193_v28  ;;  %3059 = vmatprep.subr.mxu0 %v3307_v10 }
 0x3c0   :  { %3084 = vmatprep.subr.mxu1 %v3307_v10  ;;  %3060 = vmatpush3.msra.mxu0 %v2104_v52 }
 0x3c1   :  { %3085 = vmatpush3.msra.mxu1 %v2192_v0  ;;  %3061 = vmatprep.subr.mxu0 %v3307_v10 }
 0x3c2   :  { %3086 = vmatprep.subr.mxu1 %v3307_v10  ;;  %3062 = vmatpush3.msra.mxu0 %v2103_v57 }
 0x3c3   :  { %3087 = vmatpush3.msra.mxu1 %v2191_v49  ;;  %3063 = vmatprep.subr.mxu0 %v3307_v10 }
 0x3c4   :  { %3088 = vmatprep.subr.mxu1 %v3307_v10  ;;  %3064 = vmatpush3.msra.mxu0 %v2102_v30 }
 0x3c5   :  { %3089 = vmatpush3.msra.mxu1 %v2190_v59  ;;  %3065 = vmatprep.subr.mxu0 %v3307_v10 }
 0x3c6   :  { %3090 = vmatprep.subr.mxu1 %v3307_v10  ;;  %3066 = vmatpush3.msra.mxu0 %v2101_v45 }
 0x3c7   :  { %3091 = vmatpush3.msra.mxu1 %v2189_v58  ;;  %3067 = vmatprep.subr.mxu0 %v3307_v10 }
 0x3c8   :  { %3092 = vmatprep.subr.mxu1 %v3307_v10  ;;  %3068 = vmatpush3.msra.mxu0 %v2100_v5 }
 0x3c9   :  { %3093 = vmatpush3.msra.mxu1 %v2188_v61  ;;  %3069 = vmatprep.subr.mxu0 %v3307_v10 }
 0x3ca   :  { %3094 = vmatprep.subr.mxu1 %v3307_v10  ;;  %3070 = vmatpush3.msra.mxu0 %v2099_v7 }
 0x3cb   :  { %3095 = vmatpush3.msra.mxu1 %v2187_v51  ;;  %3071 = vmatprep.subr.mxu0 %v3307_v10 }
 0x3cc   :  { %3096 = vmatprep.subr.mxu1 %v3307_v10  ;;  %3072 = vmatpush3.msra.mxu0 %v2098_v24 }
 0x3cd   :  { %3097 = vmatpush3.msra.mxu1 %v2186_v41  ;;  %3073 = vmatprep.subr.mxu0 %v3307_v10 }
 0x3ce   :  { %3098 = vmatprep.subr.mxu1 %v3307_v10  ;;  %3074 = vmatpush3.msra.mxu0 %v2097_v23 }
 0x3cf   :  { %3075 = vmatprep.mubr.msk.f32.mxu0 %vm3308_vm6, %v3307_v10  ;;  %3099 = vmatpush3.msra.mxu1 %v2185_v14 }
 0x3d0   :  { %3076 = vmatmul.mubr.msk.f32.vlgmr.msra.gmra.mxu0 %vm1253_vm8, %v4251_v54  ;;  %3100 = vmatprep.subr.mxu1 %v3307_v10  ;;  %v2368_v54 = vld [vmem:[#allocation7 + $0x530] sm:$0xff] }
 0x3d1   :  { %3105 = vmatprep.subr.mxu0 %v3307_v10  ;;  %3101 = vmatpush3.msra.mxu1 %v2184_v3 }
 0x3d2   :  { %3102 = vmatprep.mubr.msk.f32.mxu1 %vm3308_vm6, %v3307_v10  ;;  %3106 = vmatpush3.msra.mxu0 %v2282_v17 }
 0x3d3   :  { %3103 = vmatmul.mubr.msk.f32.vlgmr.msra.gmra.mxu1 %vm1253_vm8, %v4263_v6  ;;  %3107 = vmatprep.subr.mxu0 %v3307_v10  ;;  %v2366_v6 = vld [vmem:[#allocation7 + $0x520] sm:$0xff] }
 0x3d4   :  { %3132 = vmatprep.subr.mxu1 %v3307_v10  ;;  %3108 = vmatpush3.msra.mxu0 %v2281_v55 }
 0x3d5   :  { %3133 = vmatpush3.msra.mxu1 %v2369_v12  ;;  %3109 = vmatprep.subr.mxu0 %v3307_v10 }
 0x3d6   :  { %3134 = vmatprep.subr.mxu1 %v3307_v10  ;;  %3110 = vmatpush3.msra.mxu0 %v2280_v42 }
 0x3d7   :  { %3135 = vmatpush3.msra.mxu1 %v2368_v54  ;;  %3111 = vmatprep.subr.mxu0 %v3307_v10 }
 0x3d8   :  { %3136 = vmatprep.subr.mxu1 %v3307_v10  ;;  %3112 = vmatpush3.msra.mxu0 %v2279_v19 }
 0x3d9   :  { %3137 = vmatpush3.msra.mxu1 %v2367_v44  ;;  %3113 = vmatprep.subr.mxu0 %v3307_v10 }
 0x3da   :  { %3138 = vmatprep.subr.mxu1 %v3307_v10  ;;  %3114 = vmatpush3.msra.mxu0 %v2278_v39 }
 0x3db   :  { %3139 = vmatpush3.msra.mxu1 %v2366_v6  ;;  %3115 = vmatprep.subr.mxu0 %v3307_v10 }
 0x3dc   :  { %3140 = vmatprep.subr.mxu1 %v3307_v10  ;;  %3116 = vmatpush3.msra.mxu0 %v2277_v43 }
 0x3dd   :  { %3141 = vmatpush3.msra.mxu1 %v2365_v27  ;;  %3117 = vmatprep.subr.mxu0 %v3307_v10 }
 0x3de   :  { %3142 = vmatprep.subr.mxu1 %v3307_v10  ;;  %3118 = vmatpush3.msra.mxu0 %v2276_v15 }
 0x3df   :  { %3143 = vmatpush3.msra.mxu1 %v2364_v26  ;;  %3119 = vmatprep.subr.mxu0 %v3307_v10 }
 0x3e0   :  { %3144 = vmatprep.subr.mxu1 %v3307_v10  ;;  %3120 = vmatpush3.msra.mxu0 %v2275_v1 }
 0x3e1   :  { %3145 = vmatpush3.msra.mxu1 %v2363_v60  ;;  %3121 = vmatprep.subr.mxu0 %v3307_v10 }
 0x3e2   :  { %3146 = vmatprep.subr.mxu1 %v3307_v10  ;;  %3122 = vmatpush3.msra.mxu0 %v2274_v20 }
 0x3e3   :  { %3147 = vmatpush3.msra.mxu1 %v2362_v9  ;;  %3123 = vmatprep.subr.mxu0 %v3307_v10  ;;  %v2585_v9 = vld [vmem:[%s4462_s3] ss:$0 sm:$0xff]  ;;  %s2560_s3 = sshll.u32 %s3309_s13, 4  ;;  %s2561_s3 = int_to_ptr.vmem [resolvable:$true] %s2560_s3 }
 0x3e4   :  { %3148 = vmatprep.subr.mxu1 %v3307_v10  ;;  %3124 = vmatpush3.msra.mxu0 %v2273_v4  ;;  %s3267_s14 = scalar_lea.vmem %s2561_s3, 128  ;;  %p3272_p2 = scmp.lt.s32.totalorder %s2561_s3, %s2561_s3 }
 0x3e5   :  { %3149 = vmatpush3.msra.mxu1 %v2361_v46  ;;  %3125 = vmatprep.subr.mxu0 %v3307_v10  ;;  %p3268_p1 = scmp.ne.s32.totalorder %s2561_s3, %s3267_s14  ;;  %p3273_p3 = scmp.lt.s32.totalorder %s3267_s14, %s3267_s14 }
 0x3e6   :  { %3150 = vmatprep.subr.mxu1 %v3307_v10  ;;  %3126 = vmatpush3.msra.mxu0 %v2272_v50 }
 0x3e7   :  { %3151 = vmatpush3.msra.mxu1 %v2360_v36  ;;  %3127 = vmatprep.subr.mxu0 %v3307_v10  ;;  %p3274_p4 = por %p3273_p3, %p3272_p2 }
 0x3e8   :  { %3152 = vmatprep.subr.mxu1 %v3307_v10  ;;  %3128 = vmatpush3.msra.mxu0 %v2271_v22 }
 0x3e9   :  { %3129 = vmatprep.mubr.msk.f32.mxu0 %vm3308_vm6, %v3307_v10  ;;  %3153 = vmatpush3.msra.mxu1 %v2359_v21  ;;  %p3275_p5 = pnand %p3274_p4, %p3268_p1 }
 0x3ea   :  { %3130 = vmatmul.mubr.msk.f32.vlgmr.msra.gmra.mxu0 %vm1253_vm8, %v4275_v35  ;;  %3154 = vmatprep.subr.mxu1 %v3307_v10  ;;  %v2453_v35 = vld [vmem:[#allocation7 + $0x580] sm:$0xff] }
 0x3eb   :  { %3159 = vmatprep.subr.mxu0 %v3307_v10  ;;  %3155 = vmatpush3.msra.mxu1 %v2358_v2 }
 0x3ec   :  { %3156 = vmatprep.mubr.msk.f32.mxu1 %vm3308_vm6, %v3307_v10  ;;  %3160 = vmatpush3.msra.mxu0 %v2456_v47 }
 0x3ed   :  { %3157 = vmatmul.mubr.msk.f32.vlgmr.msra.gmra.mxu1 %vm1253_vm8, %v4286_v38  ;;  %3161 = vmatprep.subr.mxu0 %v3307_v10  ;;  %v2450_v38 = vld [vmem:[#allocation7 + $0x568] sm:$0xff] }
 0x3ee   :  { %3162 = vmatpush3.msra.mxu0 %v2455_v32  ;;  %3183 = vmatprep.mubr.msk.f32.mxu0 %vm3308_vm6, %v3307_v10 }
 0x3ef   :  { %3163 = vmatprep.subr.mxu0 %v3307_v10 }
 0x3f0   :  { %3164 = vmatpush3.msra.mxu0 %v2454_v56 }
 0x3f1   :  { %3165 = vmatprep.subr.mxu0 %v3307_v10 }
 0x3f2   :  { %3166 = vmatpush3.msra.mxu0 %v2453_v35 }
 0x3f3   :  { %3167 = vmatprep.subr.mxu0 %v3307_v10 }
 0x3f4   :  { %3168 = vmatpush3.msra.mxu0 %v2452_v16 }
 0x3f5   :  { %3169 = vmatprep.subr.mxu0 %v3307_v10 }
 0x3f6   :  { %3170 = vmatpush3.msra.mxu0 %v2451_v62 }
 0x3f7   :  { %3171 = vmatprep.subr.mxu0 %v3307_v10 }
 0x3f8   :  { %3172 = vmatpush3.msra.mxu0 %v2450_v38 }
 0x3f9   :  { %3173 = vmatprep.subr.mxu0 %v3307_v10 }
 0x3fa   :  { %3174 = vmatpush3.msra.mxu0 %v2449_v40 }
 0x3fb   :  { %3175 = vmatprep.subr.mxu0 %v3307_v10 }
 0x3fc   :  { %3176 = vmatpush3.msra.mxu0 %v2448_v63 }
 0x3fd   :  { %3177 = vmatprep.subr.mxu0 %v3307_v10 }
 0x3fe   :  { %3178 = vmatpush3.msra.mxu0 %v2447_v48 }
 0x3ff   :  { %3179 = vmatprep.subr.mxu0 %v3307_v10 }
 0x400   :  { %3180 = vmatpush3.msra.mxu0 %v2446_v29 }
 0x401   :  { %3181 = vmatprep.subr.mxu0 %v3307_v10 }
 0x402   :  { %3182 = vmatpush3.msra.mxu0 %v2445_v13 }
 0x403   :  { %3184 = vmatmul.mubr.msk.f32.vlgmr.msra.gmra.mxu0 %vm1253_vm8, %v1224_v37 }
 0x40d   :  { %v1396_v8 = vpop.f32.mrf.mxu1 }
 0x40f   :  { %v2834_v53 = vpop.f32.mrf.mxu1 }
 0x415   :  { %v1323_v18 = vpop.f32.mrf.mxu0 }
 0x416   :  { %v1397_v33 = vadd.f32 %v1396_v8, %v1323_v18 }
 0x417   :  { %v2807_v11 = vpop.f32.mrf.mxu0 }
 0x426   :  { %v1569_v34 = vpop.f32.mrf.mxu1 }
 0x428   :  { %v2888_v25 = vpop.f32.mrf.mxu1 }
 0x42d   :  { %v1482_v28 = vpop.f32.mrf.mxu0 }
 0x42e   :  { %v1486_v52 = vadd.f32 %v1482_v28, %v1397_v33 }
 0x42f   :  { %v2861_v0 = vpop.f32.mrf.mxu0 }
 0x430   :  { %v1573_v57 = vadd.f32 %v1569_v34, %v1486_v52 }
 0x442   :  { %v1743_v49 = vpop.f32.mrf.mxu1 }
 0x444   :  { %v2942_v30 = vpop.f32.mrf.mxu1 }
 0x445   :  { %v1656_v59 = vpop.f32.mrf.mxu0 }
 0x446   :  { %v1660_v45 = vadd.f32 %v1656_v59, %v1573_v57 }
 0x447   :  { %v2915_v58 = vpop.f32.mrf.mxu0 }
 0x448   :  { %v1747_v10 = vadd.f32 %v1743_v49, %v1660_v45 }
 0x45d   :  { %v1830_v5 = vpop.f32.mrf.mxu0 }
 0x45e   :  { %v1834_v61 = vadd.f32 %v1830_v5, %v1747_v10 }
 0x45f   :  { %v2969_v7 = vpop.f32.mrf.mxu0  ;;  %v1917_v51 = vpop.f32.mrf.mxu1 }
 0x460   :  { %v1921_v24 = vadd.f32 %v1917_v51, %v1834_v61 }
 0x461   :  { %v2996_v41 = vpop.f32.mrf.mxu1 }
 0x476   :  { %v2004_v23 = vpop.f32.mrf.mxu0 }
 0x477   :  { %v2008_v14 = vadd.f32 %v2004_v23, %v1921_v24 }
 0x478   :  { %v3023_v3 = vpop.f32.mrf.mxu0 }
 0x479   :  { %v2091_v17 = vpop.f32.mrf.mxu1 }
 0x47a   :  { %v2095_v55 = vadd.f32 %v2091_v17, %v2008_v14 }
 0x47b   :  { %v3050_v12 = vpop.f32.mrf.mxu1 }
 0x490   :  { %v2178_v42 = vpop.f32.mrf.mxu0 }
 0x491   :  { %v2182_v15 = vadd.f32 %v2178_v42, %v2095_v55 }
 0x492   :  { %v3077_v54 = vpop.f32.mrf.mxu0 }
 0x493   :  { %v2265_v19 = vpop.f32.mrf.mxu1 }
 0x494   :  { %v2269_v26 = vadd.f32 %v2265_v19, %v2182_v15 }
 0x495   :  { %v3104_v44 = vpop.f32.mrf.mxu1 }
 0x4aa   :  { %v2352_v39 = vpop.f32.mrf.mxu0 }
 0x4ab   :  { %v2356_v1 = vadd.f32 %v2352_v39, %v2269_v26 }
 0x4ac   :  { %v3131_v6 = vpop.f32.mrf.mxu0 }
 0x4ad   :  { %v2439_v43 = vpop.f32.mrf.mxu1 }
 0x4ae   :  { %v2443_v60 = vadd.f32 %v2439_v43, %v2356_v1 }
 0x4af   :  { %v3158_v27 = vpop.f32.mrf.mxu1 }
 0x4c3   :  { %v2526_v20 = vpop.f32.mrf.mxu0 }
 0x4c4   :  { %v2530_v4 = vadd.f32 %v2526_v20, %v2443_v60 }
 0x4c5   :  { %v3185_v46 = vpop.f32.mrf.mxu0 }
 0x4c6   :  { %v2538_v50 = vadd.f32 %v2585_v9, %v2530_v4 }
 0x4c8   :  { %v2540_v36 = vsel %vm2539_vm9, %v2538_v50, -inf }
 0x4c9   :  { %2541 = vmax.xlane.f32.xlu0 %v2540_v36 }
 0x552   :  { %v2542_v22 = vpop.xlane.xlu0 %2541 }
 0x553   :  { %v2543_v21 = vsub.f32 %v2538_v50, %v2542_v22 }
 0x555   :  { %v2544_v2 = vmul.f32 1.442695, %v2543_v21 }
 0x557   :  { %3203 = vpow2.f32 %v2544_v2 }
 0x564   :  { %v3204_v47 = vpop.eup %3203 }
 0x565   :  { %v2546_v32 = vsel %vm2539_vm9, %v3204_v47, 0.0 }
 0x566   :  { %2547 = vadd.xlane.f32.xlu1 %v2546_v32 }
 0x5ef   :  { %v2548_v56 = vpop.xlane.xlu1 %2547 }
 0x5f0   :  { %3205 = vlog2.f32 %v2548_v56 }
 0x5fd   :  { %v3206_v35 = vpop.eup %3205 }
 0x5fe   :  { %v2550_v16 = vmul.f32 0.6931472, %v3206_v35 }
 0x600   :  { %v2551_v62 = vadd.f32 %v2550_v16, %v2542_v22 }
 0x602   :  { %v2552_v38 = vsub.f32 %v2538_v50, %v2551_v62 }
 0x604   :  { %2553 = vst [vmem:[#allocation8] sm:$0xff] %v2552_v38 }
 0x605   :  { %3278 = shalt.err (!%p3275_p5)
}
 0x606   :  { %2563 = dma.vmem_to_hbm [thread:$0]  %s2561_s3, 128, %s4463_s4, [#allocation4]  }
 0x607   :  { %3291 = dma.done.wait [#allocation4], 128  }
 0x608   :  { %3292 = vsyncadd [#allocation4], 4294967168 }
 0x609   :  { %2567 = vsyncpa [#allocation3], 1 }
 0x60a   :  { %2568 = vsyncpa [#allocation6], 1 }
 0x60b   :  { %2569 = vsyncpa [#allocation4], 1 }

</bundles_post_ra>
